<compile_context>
chip_gen: v6e
topology: v6e:2x2x1
jax: 0.10.0
libtpu: 0.0.40
codegen_flags: <defaults>
</compile_context>

<pallas_src>
import functools

import jax
import jax.numpy as jnp
from jax.experimental import pallas as pl
from jax.experimental.pallas import tpu as pltpu

_BN_EPS = 1e-5


def _basic_block_kernel(xp_ref, w1_ref, g1_ref, be1_ref, w2_ref, g2_ref, be2_ref,
                        mask_ref, out_ref,
                        y1_scr, y2_scr, s1_ref, q1_ref, s2_ref, q2_ref,
                        bn1_scr, bn2_scr, *res_scr,
                        N, H, W, Wp, Cout, K, Lp, residual, compute_dtype):
    HWp = H * Wp                       # conv output length in padded-width coordinates
    pp = (K - 1) // 2                  # 'same' conv => padding == (K-1)//2
    ioff = pp * (Wp + 1)               # flat offset of the padded-image interior
    phase = pl.program_id(0)           # 0: conv1+stats  1: bn1/relu/conv2+stats  2: bn2/res/relu
    n = pl.program_id(1)               # image index
    inv_cnt = 1.0 / float(N * H * W)   # BN divides by the number of VALID positions only

    def conv_taps(img, w_ref):
        # img: (C, Lp) flat zero-padded image, lane axis = flattened padded spatial.
        # Each tap is a static lane-shifted view; K*K tiny matmuls accumulate in f32.
        acc = None
        for t in range(K * K):
            off = (t // K) * Wp + (t % K)
            part = jnp.dot(w_ref[t], img[:, off:off + HWp],
                           preferred_element_type=jnp.float32)
            acc = part if acc is None else acc + part
        return acc                      # (Cout, HWp) float32

    # ---- one-time init of the BN accumulators --------------------------------------
    @pl.when((phase == 0) & (n == 0))
    def _init():
        s1_ref[...] = jnp.zeros_like(s1_ref)
        q1_ref[...] = jnp.zeros_like(q1_ref)
        s2_ref[...] = jnp.zeros_like(s2_ref)
        q2_ref[...] = jnp.zeros_like(q2_ref)

    # ---- phase 0: conv1 + BN1 statistics (+ residual stash) ------------------------
    @pl.when(phase == 0)
    def _phase0():
        xp = xp_ref[0]                                        # (Cin, Lp) compute_dtype
        y1 = conv_taps(xp, w1_ref) * mask_ref[...]            # zero the Wp-W junk cols
        y1_scr[n] = y1
        s1_ref[...] += jnp.sum(y1, axis=1, keepdims=True)
        q1_ref[...] += jnp.sum(y1 * y1, axis=1, keepdims=True)
        if residual:
            # identity = interior of the padded input in output coords (lane-dense);
            # stashed so phases 1/2 never re-DMA the input from HBM.
            res_scr[0][n] = xp[:, ioff:ioff + HWp]

    # ---- phase 1: BN1 + ReLU + conv2 + BN2 statistics ------------------------------
    @pl.when(phase == 1)
    def _phase1():
        @pl.when(n == 0)
        def _finalize_bn1():                                  # hoisted: once per phase
            # NOTE: one-pass var = E[x^2]-E[x]^2 is cancellation-prone at large scale;
            # fine at these magnitudes, switch to Welford/two-pass if scaled up.
            mean = s1_ref[...] * inv_cnt
            var = q1_ref[...] * inv_cnt - mean * mean
            scale = g1_ref[...] * jax.lax.rsqrt(var + _BN_EPS)
            shift = be1_ref[...] - mean * scale
            # fold the valid-column mask into the broadcast scale/shift so the junk
            # columns of a1 come out exactly 0 (they are conv2's zero halo).
            bn1_scr[0] = scale * mask_ref[...]
            bn1_scr[1] = shift * mask_ref[...]

        a1 = jnp.maximum(y1_scr[n] * bn1_scr[0] + bn1_scr[1], 0.0)
        # zero-padded activation for conv2, built as a value (halo = concatenated 0s).
        zl = jnp.zeros((Cout, ioff), compute_dtype)
        zr = jnp.zeros((Cout, Lp - ioff - HWp), compute_dtype)
        a1p = jnp.concatenate([zl, a1.astype(compute_dtype), zr], axis=1)  # (Cout, Lp)
        y2 = conv_taps(a1p, w2_ref) * mask_ref[...]
        y2_scr[n] = y2
        s2_ref[...] += jnp.sum(y2, axis=1, keepdims=True)
        q2_ref[...] += jnp.sum(y2 * y2, axis=1, keepdims=True)

    # ---- phase 2: BN2 + residual + ReLU, lane-dense store --------------------------
    @pl.when(phase == 2)
    def _phase2():
        @pl.when(n == 0)
        def _finalize_bn2():
            mean = s2_ref[...] * inv_cnt
            var = q2_ref[...] * inv_cnt - mean * mean
            scale = g2_ref[...] * jax.lax.rsqrt(var + _BN_EPS)
            shift = be2_ref[...] - mean * scale
            bn2_scr[0] = jnp.broadcast_to(scale, (Cout, HWp))
            bn2_scr[1] = jnp.broadcast_to(shift, (Cout, HWp))

        y = y2_scr[n] * bn2_scr[0] + bn2_scr[1]
        if residual:
            y = y + res_scr[0][n].astype(jnp.float32)
        out_ref[0] = jnp.maximum(y, 0.0).astype(out_ref.dtype)


def init_basic_block_params(key, in_channel, kernel_size, out_channel=None):
    """Deterministic synthetic params matching the PyTorch module's shapes."""
    cin = in_channel
    cout = in_channel if out_channel is None else out_channel
    k = kernel_size
    k1, k2, k3, k4 = jax.random.split(key, 4)
    w1 = jax.random.normal(k1, (cout, cin, k, k), jnp.float32) * 0.2
    b1 = jax.random.normal(k2, (cout,), jnp.float32) * 0.1
    w2 = jax.random.normal(k3, (cout, cout, k, k), jnp.float32) * 0.2
    b2 = jax.random.normal(k4, (cout,), jnp.float32) * 0.1
    g1 = jnp.ones((cout,), jnp.float32)
    be1 = jnp.zeros((cout,), jnp.float32)
    g2 = jnp.ones((cout,), jnp.float32)
    be2 = jnp.zeros((cout,), jnp.float32)
    return dict(w1=w1, b1=b1, g1=g1, be1=be1, w2=w2, b2=b2, g2=g2, be2=be2)


def basic_block_forward(x_nchw, params, kernel_size, padding, out_channel=None,
                        compute_dtype=jnp.float32):
    """Fused BasicBlock forward.  compute_dtype=bf16 -> MXU-native matmul operands."""
    N, Cin, H, W = x_nchw.shape
    residual = out_channel is None
    Cout = Cin if residual else out_channel
    K, P = kernel_size, padding
    Hp, Wp = H + 2 * P, W + 2 * P
    assert Hp - K + 1 == H and Wp - K + 1 == W, \
        "BasicBlock requires 'same'-size convolutions"
    HWp = H * Wp
    Lp = Hp * Wp + (K - 1)     # tail zeros so every tap's shifted window stays in-bounds

    # NCHW is already channel-major / spatial-minor: pad the spatial dims, flatten them
    # into one lane-dense axis, cast ONCE to the matmul compute dtype (no NHWC shuffle).
    xpad = jnp.pad(x_nchw, ((0, 0), (0, 0), (P, P), (P, P)))
    xflat = jnp.pad(xpad.reshape(N, Cin, Hp * Wp),
                    ((0, 0), (0, 0), (0, K - 1))).astype(compute_dtype)

    def to_taps(w):            # (Cout, C, K, K) -> (K*K, Cout, C) per-tap matrices
        return jnp.transpose(w, (2, 3, 0, 1)).reshape(
            K * K, w.shape[0], w.shape[1]).astype(compute_dtype)

    col = lambda v: v.reshape(-1, 1).astype(jnp.float32)

    # conv biases intentionally dropped: bias + train-mode BN mean-subtraction cancels.
    w1t, w2t = to_taps(params["w1"]), to_taps(params["w2"])

    # valid-column mask: output coord q = h*Wp + w', valid iff (q % Wp) < W.
    mask = (jnp.arange(HWp, dtype=jnp.int32) % Wp < W).astype(
        jnp.float32).reshape(1, HWp)

    kernel = functools.partial(
        _basic_block_kernel, N=N, H=H, W=W, Wp=Wp, Cout=Cout, K=K, Lp=Lp,
        residual=residual, compute_dtype=compute_dtype)

    last = N - 1
    # input is only needed in phase 0 (and is stashed for the residual), so phases 1/2
    # pin the block index -> no re-fetch; output writes back only at phase 2.
    x_map = lambda p, n_: (jnp.where(p == 0, n_, last), 0, 0)
    out_map = lambda p, n_: (jnp.where(p == 2, n_, 0), 0, 0)
    const3 = lambda p, n_: (0, 0, 0)
    const2 = lambda p, n_: (0, 0)

    scratch = [
        pltpu.VMEM((N, Cout, HWp), jnp.float32),   # conv1 raw stash (junk cols zeroed)
        pltpu.VMEM((N, Cout, HWp), jnp.float32),   # conv2 raw stash (junk cols zeroed)
        pltpu.VMEM((Cout, 1), jnp.float32),        # BN1 sum
        pltpu.VMEM((Cout, 1), jnp.float32),        # BN1 sum of squares
        pltpu.VMEM((Cout, 1), jnp.float32),        # BN2 sum
        pltpu.VMEM((Cout, 1), jnp.float32),        # BN2 sum of squares
        pltpu.VMEM((2, Cout, HWp), jnp.float32),   # BN1 scale/shift (broadcast, masked)
        pltpu.VMEM((2, Cout, HWp), jnp.float32),   # BN2 scale/shift (broadcast)
    ]
    if residual:
        scratch.append(pltpu.VMEM((N, Cin, HWp), compute_dtype))   # identity stash

    item = jnp.dtype(compute_dtype).itemsize
    flops = 2 * N * HWp * K * K * Cout * (Cin + Cout) + 12 * N * HWp * Cout
    bytes_accessed = (xflat.size * item + N * Cout * HWp * 4
                      + (w1t.size + w2t.size) * item)

    out = pl.pallas_call(
        kernel,
        out_shape=jax.ShapeDtypeStruct((N, Cout, HWp), jnp.float32),
        grid_spec=pltpu.PrefetchScalarGridSpec(
            num_scalar_prefetch=0,
            grid=(3, N),                                   # (phase, image)
            in_specs=[
                pl.BlockSpec((1, Cin, Lp), x_map),
                pl.BlockSpec((K * K, Cout, Cin), const3),
                pl.BlockSpec((Cout, 1), const2),
                pl.BlockSpec((Cout, 1), const2),
                pl.BlockSpec((K * K, Cout, Cout), const3),
                pl.BlockSpec((Cout, 1), const2),
                pl.BlockSpec((Cout, 1), const2),
                pl.BlockSpec((1, HWp), const2),
            ],
            out_specs=pl.BlockSpec((1, Cout, HWp), out_map),
            scratch_shapes=scratch),
        compiler_params=pltpu.CompilerParams(
            # image axis carries the cross-image BN reduction through shared VMEM
            # accumulators, so both axes must stay "arbitrary" (sequential).
            dimension_semantics=("arbitrary", "arbitrary"),
            vmem_limit_bytes=32 * 1024 * 1024),
        cost_estimate=pl.CostEstimate(flops=int(flops),
                                      transcendentals=int(4 * Cout),
                                      bytes_accessed=int(bytes_accessed)),
    )(xflat, w1t, col(params["g1"]), col(params["be1"]),
      w2t, col(params["g2"]), col(params["be2"]), mask)

    # (N, Cout, H*Wp) -> drop the Wp-W junk columns -> NCHW.  Pure XLA layout glue.
    return out.reshape(N, Cout, H, Wp)[..., :W]


def basic_block_reference(x_nchw, params, kernel_size, padding, out_channel=None):
    """Pure-JAX reference (NCHW), mirrors the PyTorch forward in train mode."""
    residual = out_channel is None
    P = padding

    def conv(x, w, b):
        y = jax.lax.conv_general_dilated(
            x, w, window_strides=(1, 1), padding=[(P, P), (P, P)],
            dimension_numbers=("NCHW", "OIHW", "NCHW"))
        return y + b[None, :, None, None]

    def bn(y, g, be):
        mean = jnp.mean(y, axis=(0, 2, 3), keepdims=True)
        var = jnp.mean((y - mean) ** 2, axis=(0, 2, 3), keepdims=True)
        return ((y - mean) * jax.lax.rsqrt(var + _BN_EPS)
                * g[None, :, None, None] + be[None, :, None, None])

    y = bn(conv(x_nchw, params["w1"], params["b1"]), params["g1"], params["be1"])
    y = jnp.maximum(y, 0.0)
    y = bn(conv(y, params["w2"], params["b2"]), params["g2"], params["be2"])
    if residual:
        y = y + x_nchw
    return jnp.maximum(y, 0.0)


if __name__ == "__main__":
    key = jax.random.PRNGKey(0)
    kx, kp, kp2 = jax.random.split(key, 3)

    # BasicBlock(in_channel=4, kernel_size=3, padding=1)
    N, C, H, W = 2, 4, 16, 16
    K, P = 3, 1
    x = jax.random.normal(kx, (N, C, H, W), jnp.float32)

    # 1) residual block (out_channel=None), f32 matmul operands
    params = init_basic_block_params(kp, C, K, out_channel=None)
    out = jax.block_until_ready(basic_block_forward(x, params, K, P))
    ref = basic_block_reference(x, params, K, P)
    assert out.shape == (N, C, H, W)
    err = float(jnp.max(jnp.abs(out - ref)))
    if err > 5e-2:
        raise AssertionError(f"f32 residual path mismatch: max abs err {err}")

    # 2) same block with bf16 activations/weights (MXU-native matmul path)
    out_bf = jax.block_until_ready(
        basic_block_forward(x, params, K, P, compute_dtype=jnp.bfloat16))
    err_bf = float(jnp.max(jnp.abs(out_bf - ref)))
    if err_bf > 1e-1:
        raise AssertionError(f"bf16 matmul path mismatch: max abs err {err_bf}")

    # 3) non-residual variant (out_channel != in_channel)
    C2 = 8
    params2 = init_basic_block_params(kp2, C, K, out_channel=C2)
    out2 = jax.block_until_ready(
        basic_block_forward(x, params2, K, P, out_channel=C2))
    ref2 = basic_block_reference(x, params2, K, P, out_channel=C2)
    assert out2.shape == (N, C2, H, W)
    err2 = float(jnp.max(jnp.abs(out2 - ref2)))
    if err2 > 5e-2:
        raise AssertionError(f"non-residual path mismatch: max abs err {err2}")

    print("KERNEL_OK")
</pallas_src>

<mosaic_0001>
module attributes {stable_mosaic.version = 11 : i64} {
  func.func @_basic_block_kernel(%arg0: i32, %arg1: i32, %arg2: memref<1x4x326xf32, #tpu.memory_space<vmem>>, %arg3: memref<9x4x4xf32, #tpu.memory_space<vmem>>, %arg4: memref<4x1xf32, #tpu.memory_space<vmem>>, %arg5: memref<4x1xf32, #tpu.memory_space<vmem>>, %arg6: memref<9x4x4xf32, #tpu.memory_space<vmem>>, %arg7: memref<4x1xf32, #tpu.memory_space<vmem>>, %arg8: memref<4x1xf32, #tpu.memory_space<vmem>>, %arg9: memref<1x288xf32, #tpu.memory_space<vmem>>, %arg10: memref<1x4x288xf32, #tpu.memory_space<vmem>>, %arg11: memref<2x4x288xf32, #tpu.memory_space<vmem>>, %arg12: memref<2x4x288xf32, #tpu.memory_space<vmem>>, %arg13: memref<4x1xf32, #tpu.memory_space<vmem>>, %arg14: memref<4x1xf32, #tpu.memory_space<vmem>>, %arg15: memref<4x1xf32, #tpu.memory_space<vmem>>, %arg16: memref<4x1xf32, #tpu.memory_space<vmem>>, %arg17: memref<2x4x288xf32, #tpu.memory_space<vmem>>, %arg18: memref<2x4x288xf32, #tpu.memory_space<vmem>>, %arg19: memref<2x4x288xf32, #tpu.memory_space<vmem>>) attributes {dimension_semantics = [#tpu.dimension_semantics<arbitrary>, #tpu.dimension_semantics<arbitrary>], iteration_bounds = array<i64: 3, 2>, scalar_prefetch = 0 : i64, scratch_operands = 9 : i64, tpu.core_type = #tpu.core_type<tc>, window_params = [{transform_indices = @transform_0, window_bounds = array<i64: 1, 4, 326>}, {pipeline_mode = #tpu.pipeline_mode<synchronous>, transform_indices = @transform_1, window_bounds = array<i64: 9, 4, 4>}, {pipeline_mode = #tpu.pipeline_mode<synchronous>, transform_indices = @transform_2, window_bounds = array<i64: 4, 1>}, {pipeline_mode = #tpu.pipeline_mode<synchronous>, transform_indices = @transform_3, window_bounds = array<i64: 4, 1>}, {pipeline_mode = #tpu.pipeline_mode<synchronous>, transform_indices = @transform_4, window_bounds = array<i64: 9, 4, 4>}, {pipeline_mode = #tpu.pipeline_mode<synchronous>, transform_indices = @transform_5, window_bounds = array<i64: 4, 1>}, {pipeline_mode = #tpu.pipeline_mode<synchronous>, transform_indices = @transform_6, window_bounds = array<i64: 4, 1>}, {pipeline_mode = #tpu.pipeline_mode<synchronous>, transform_indices = @transform_7, window_bounds = array<i64: 1, 288>}, {transform_indices = @transform_8, window_bounds = array<i64: 1, 4, 288>}]} {
    %c0_i32 = arith.constant 0 : i32
    %0 = arith.cmpi eq, %arg0, %c0_i32 : i32
    %c0_i32_0 = arith.constant 0 : i32
    %1 = arith.cmpi eq, %arg1, %c0_i32_0 : i32
    %2 = arith.andi %0, %1 : i1
    %3 = arith.extui %2 : i1 to i32
    %c0_i32_1 = arith.constant 0 : i32
    %4 = arith.cmpi ne, %3, %c0_i32_1 : i32
    scf.if %4 {
      %cst = arith.constant 0.000000e+00 : f32
      %14 = vector.broadcast %cst : f32 to vector<4x1xf32>
      %c0 = arith.constant 0 : index
      %c0_6 = arith.constant 0 : index
      %15 = vector.load %arg13[%c0, %c0_6] : memref<4x1xf32, #tpu.memory_space<vmem>>, vector<4x1xf32>
      tpu.vector_store %arg13[%c0, %c0_6], %14 {strides = array<i32>} : memref<4x1xf32, #tpu.memory_space<vmem>>, vector<4x1xf32>,
      %cst_7 = arith.constant 0.000000e+00 : f32
      %16 = vector.broadcast %cst_7 : f32 to vector<4x1xf32>
      %c0_8 = arith.constant 0 : index
      %c0_9 = arith.constant 0 : index
      %17 = vector.load %arg14[%c0_8, %c0_9] : memref<4x1xf32, #tpu.memory_space<vmem>>, vector<4x1xf32>
      tpu.vector_store %arg14[%c0_8, %c0_9], %16 {strides = array<i32>} : memref<4x1xf32, #tpu.memory_space<vmem>>, vector<4x1xf32>,
      %cst_10 = arith.constant 0.000000e+00 : f32
      %18 = vector.broadcast %cst_10 : f32 to vector<4x1xf32>
      %c0_11 = arith.constant 0 : index
      %c0_12 = arith.constant 0 : index
      %19 = vector.load %arg15[%c0_11, %c0_12] : memref<4x1xf32, #tpu.memory_space<vmem>>, vector<4x1xf32>
      tpu.vector_store %arg15[%c0_11, %c0_12], %18 {strides = array<i32>} : memref<4x1xf32, #tpu.memory_space<vmem>>, vector<4x1xf32>,
      %cst_13 = arith.constant 0.000000e+00 : f32
      %20 = vector.broadcast %cst_13 : f32 to vector<4x1xf32>
      %c0_14 = arith.constant 0 : index
      %c0_15 = arith.constant 0 : index
      %21 = vector.load %arg16[%c0_14, %c0_15] : memref<4x1xf32, #tpu.memory_space<vmem>>, vector<4x1xf32>
      tpu.vector_store %arg16[%c0_14, %c0_15], %20 {strides = array<i32>} : memref<4x1xf32, #tpu.memory_space<vmem>>, vector<4x1xf32>,
    } else {
    }
    %c0_i32_2 = arith.constant 0 : i32
    %5 = arith.cmpi eq, %arg0, %c0_i32_2 : i32
    %6 = arith.extui %5 : i1 to i32
    %c0_i32_3 = arith.constant 0 : i32
    %7 = arith.cmpi ne, %6, %c0_i32_3 : i32
    scf.if %7 {
      %c0 = arith.constant 0 : index
      %c0_6 = arith.constant 0 : index
      %c0_7 = arith.constant 0 : index
      %14 = vector.load %arg2[%c0, %c0_6, %c0_7] : memref<1x4x326xf32, #tpu.memory_space<vmem>>, vector<1x4x326xf32>
      %15 = vector.shape_cast %14 : vector<1x4x326xf32> to vector<4x326xf32>
      %c0_8 = arith.constant 0 : index
      %c0_9 = arith.constant 0 : index
      %c0_10 = arith.constant 0 : index
      %16 = vector.load %arg3[%c0_8, %c0_9, %c0_10] : memref<9x4x4xf32, #tpu.memory_space<vmem>>, vector<1x4x4xf32>
      %17 = vector.shape_cast %16 : vector<1x4x4xf32> to vector<4x4xf32>
      %18 = vector.extract_strided_slice %15 {offsets = [0, 0], sizes = [4, 288], strides = [1, 1]} : vector<4x326xf32> to vector<4x288xf32>
      %cst = arith.constant dense<0.000000e+00> : vector<4x288xf32>
      %19 = tpu.matmul %17, %18, %cst {dimension_numbers = #tpu.dot_dimension_numbers<[1], [0], [0], [1], [0, 0, 1, 1], [], []>} : vector<4x4xf32>, vector<4x288xf32>, vector<4x288xf32> -> vector<4x288xf32>
      %c1 = arith.constant 1 : index
      %c0_11 = arith.constant 0 : index
      %c0_12 = arith.constant 0 : index
      %20 = vector.load %arg3[%c1, %c0_11, %c0_12] : memref<9x4x4xf32, #tpu.memory_space<vmem>>, vector<1x4x4xf32>
      %21 = vector.shape_cast %20 : vector<1x4x4xf32> to vector<4x4xf32>
      %22 = vector.extract_strided_slice %15 {offsets = [0, 1], sizes = [4, 288], strides = [1, 1]} : vector<4x326xf32> to vector<4x288xf32>
      %cst_13 = arith.constant dense<0.000000e+00> : vector<4x288xf32>
      %23 = tpu.matmul %21, %22, %cst_13 {dimension_numbers = #tpu.dot_dimension_numbers<[1], [0], [0], [1], [0, 0, 1, 1], [], []>} : vector<4x4xf32>, vector<4x288xf32>, vector<4x288xf32> -> vector<4x288xf32>
      %24 = arith.addf %19, %23 : vector<4x288xf32>
      %c2 = arith.constant 2 : index
      %c0_14 = arith.constant 0 : index
      %c0_15 = arith.constant 0 : index
      %25 = vector.load %arg3[%c2, %c0_14, %c0_15] : memref<9x4x4xf32, #tpu.memory_space<vmem>>, vector<1x4x4xf32>
      %26 = vector.shape_cast %25 : vector<1x4x4xf32> to vector<4x4xf32>
      %27 = vector.extract_strided_slice %15 {offsets = [0, 2], sizes = [4, 288], strides = [1, 1]} : vector<4x326xf32> to vector<4x288xf32>
      %cst_16 = arith.constant dense<0.000000e+00> : vector<4x288xf32>
      %28 = tpu.matmul %26, %27, %cst_16 {dimension_numbers = #tpu.dot_dimension_numbers<[1], [0], [0], [1], [0, 0, 1, 1], [], []>} : vector<4x4xf32>, vector<4x288xf32>, vector<4x288xf32> -> vector<4x288xf32>
      %29 = arith.addf %24, %28 : vector<4x288xf32>
      %c3 = arith.constant 3 : index
      %c0_17 = arith.constant 0 : index
      %c0_18 = arith.constant 0 : index
      %30 = vector.load %arg3[%c3, %c0_17, %c0_18] : memref<9x4x4xf32, #tpu.memory_space<vmem>>, vector<1x4x4xf32>
      %31 = vector.shape_cast %30 : vector<1x4x4xf32> to vector<4x4xf32>
      %32 = vector.extract_strided_slice %15 {offsets = [0, 18], sizes = [4, 288], strides = [1, 1]} : vector<4x326xf32> to vector<4x288xf32>
      %cst_19 = arith.constant dense<0.000000e+00> : vector<4x288xf32>
      %33 = tpu.matmul %31, %32, %cst_19 {dimension_numbers = #tpu.dot_dimension_numbers<[1], [0], [0], [1], [0, 0, 1, 1], [], []>} : vector<4x4xf32>, vector<4x288xf32>, vector<4x288xf32> -> vector<4x288xf32>
      %34 = arith.addf %29, %33 : vector<4x288xf32>
      %c4 = arith.constant 4 : index
      %c0_20 = arith.constant 0 : index
      %c0_21 = arith.constant 0 : index
      %35 = vector.load %arg3[%c4, %c0_20, %c0_21] : memref<9x4x4xf32, #tpu.memory_space<vmem>>, vector<1x4x4xf32>
      %36 = vector.shape_cast %35 : vector<1x4x4xf32> to vector<4x4xf32>
      %37 = vector.extract_strided_slice %15 {offsets = [0, 19], sizes = [4, 288], strides = [1, 1]} : vector<4x326xf32> to vector<4x288xf32>
      %cst_22 = arith.constant dense<0.000000e+00> : vector<4x288xf32>
      %38 = tpu.matmul %36, %37, %cst_22 {dimension_numbers = #tpu.dot_dimension_numbers<[1], [0], [0], [1], [0, 0, 1, 1], [], []>} : vector<4x4xf32>, vector<4x288xf32>, vector<4x288xf32> -> vector<4x288xf32>
      %39 = arith.addf %34, %38 : vector<4x288xf32>
      %c5 = arith.constant 5 : index
      %c0_23 = arith.constant 0 : index
      %c0_24 = arith.constant 0 : index
      %40 = vector.load %arg3[%c5, %c0_23, %c0_24] : memref<9x4x4xf32, #tpu.memory_space<vmem>>, vector<1x4x4xf32>
      %41 = vector.shape_cast %40 : vector<1x4x4xf32> to vector<4x4xf32>
      %42 = vector.extract_strided_slice %15 {offsets = [0, 20], sizes = [4, 288], strides = [1, 1]} : vector<4x326xf32> to vector<4x288xf32>
      %cst_25 = arith.constant dense<0.000000e+00> : vector<4x288xf32>
      %43 = tpu.matmul %41, %42, %cst_25 {dimension_numbers = #tpu.dot_dimension_numbers<[1], [0], [0], [1], [0, 0, 1, 1], [], []>} : vector<4x4xf32>, vector<4x288xf32>, vector<4x288xf32> -> vector<4x288xf32>
      %44 = arith.addf %39, %43 : vector<4x288xf32>
      %c6 = arith.constant 6 : index
      %c0_26 = arith.constant 0 : index
      %c0_27 = arith.constant 0 : index
      %45 = vector.load %arg3[%c6, %c0_26, %c0_27] : memref<9x4x4xf32, #tpu.memory_space<vmem>>, vector<1x4x4xf32>
      %46 = vector.shape_cast %45 : vector<1x4x4xf32> to vector<4x4xf32>
      %47 = vector.extract_strided_slice %15 {offsets = [0, 36], sizes = [4, 288], strides = [1, 1]} : vector<4x326xf32> to vector<4x288xf32>
      %cst_28 = arith.constant dense<0.000000e+00> : vector<4x288xf32>
      %48 = tpu.matmul %46, %47, %cst_28 {dimension_numbers = #tpu.dot_dimension_numbers<[1], [0], [0], [1], [0, 0, 1, 1], [], []>} : vector<4x4xf32>, vector<4x288xf32>, vector<4x288xf32> -> vector<4x288xf32>
      %49 = arith.addf %44, %48 : vector<4x288xf32>
      %c7 = arith.constant 7 : index
      %c0_29 = arith.constant 0 : index
      %c0_30 = arith.constant 0 : index
      %50 = vector.load %arg3[%c7, %c0_29, %c0_30] : memref<9x4x4xf32, #tpu.memory_space<vmem>>, vector<1x4x4xf32>
      %51 = vector.shape_cast %50 : vector<1x4x4xf32> to vector<4x4xf32>
      %52 = vector.extract_strided_slice %15 {offsets = [0, 37], sizes = [4, 288], strides = [1, 1]} : vector<4x326xf32> to vector<4x288xf32>
      %cst_31 = arith.constant dense<0.000000e+00> : vector<4x288xf32>
      %53 = tpu.matmul %51, %52, %cst_31 {dimension_numbers = #tpu.dot_dimension_numbers<[1], [0], [0], [1], [0, 0, 1, 1], [], []>} : vector<4x4xf32>, vector<4x288xf32>, vector<4x288xf32> -> vector<4x288xf32>
      %54 = arith.addf %49, %53 : vector<4x288xf32>
      %c8 = arith.constant 8 : index
      %c0_32 = arith.constant 0 : index
      %c0_33 = arith.constant 0 : index
      %55 = vector.load %arg3[%c8, %c0_32, %c0_33] : memref<9x4x4xf32, #tpu.memory_space<vmem>>, vector<1x4x4xf32>
      %56 = vector.shape_cast %55 : vector<1x4x4xf32> to vector<4x4xf32>
      %57 = vector.extract_strided_slice %15 {offsets = [0, 38], sizes = [4, 288], strides = [1, 1]} : vector<4x326xf32> to vector<4x288xf32>
      %cst_34 = arith.constant dense<0.000000e+00> : vector<4x288xf32>
      %58 = tpu.matmul %56, %57, %cst_34 {dimension_numbers = #tpu.dot_dimension_numbers<[1], [0], [0], [1], [0, 0, 1, 1], [], []>} : vector<4x4xf32>, vector<4x288xf32>, vector<4x288xf32> -> vector<4x288xf32>
      %59 = arith.addf %54, %58 : vector<4x288xf32>
      %c0_35 = arith.constant 0 : index
      %c0_36 = arith.constant 0 : index
      %60 = vector.load %arg9[%c0_35, %c0_36] : memref<1x288xf32, #tpu.memory_space<vmem>>, vector<1x288xf32>
      %61 = vector.broadcast %60 : vector<1x288xf32> to vector<4x288xf32>
      %62 = arith.mulf %59, %61 : vector<4x288xf32>
      %63 = arith.index_cast %arg1 : i32 to index
      %c0_37 = arith.constant 0 : index
      %c0_38 = arith.constant 0 : index
      %64 = vector.load %arg11[%63, %c0_37, %c0_38] : memref<2x4x288xf32, #tpu.memory_space<vmem>>, vector<1x4x288xf32>
      %65 = vector.shape_cast %64 : vector<1x4x288xf32> to vector<4x288xf32>
      %66 = vector.shape_cast %62 : vector<4x288xf32> to vector<1x4x288xf32>
      tpu.vector_store %arg11[%63, %c0_37, %c0_38], %66 {strides = array<i32>} : memref<2x4x288xf32, #tpu.memory_space<vmem>>, vector<1x4x288xf32>,
      %c0_39 = arith.constant 0 : index
      %c0_40 = arith.constant 0 : index
      %67 = vector.load %arg13[%c0_39, %c0_40] : memref<4x1xf32, #tpu.memory_space<vmem>>, vector<4x1xf32>
      %cst_41 = arith.constant dense<0.000000e+00> : vector<4xf32>
      %68 = vector.multi_reduction <add>, %62, %cst_41 [1] : vector<4x288xf32> to vector<4xf32>
      %69 = vector.shape_cast %68 : vector<4xf32> to vector<4x1xf32>
      %70 = arith.addf %67, %69 : vector<4x1xf32>
      %c0_42 = arith.constant 0 : index
      %c0_43 = arith.constant 0 : index
      %71 = vector.load %arg13[%c0_42, %c0_43] : memref<4x1xf32, #tpu.memory_space<vmem>>, vector<4x1xf32>
      tpu.vector_store %arg13[%c0_42, %c0_43], %70 {strides = array<i32>} : memref<4x1xf32, #tpu.memory_space<vmem>>, vector<4x1xf32>,
      %c0_44 = arith.constant 0 : index
      %c0_45 = arith.constant 0 : index
      %72 = vector.load %arg14[%c0_44, %c0_45] : memref<4x1xf32, #tpu.memory_space<vmem>>, vector<4x1xf32>
      %73 = arith.mulf %62, %62 : vector<4x288xf32>
      %cst_46 = arith.constant dense<0.000000e+00> : vector<4xf32>
      %74 = vector.multi_reduction <add>, %73, %cst_46 [1] : vector<4x288xf32> to vector<4xf32>
      %75 = vector.shape_cast %74 : vector<4xf32> to vector<4x1xf32>
      %76 = arith.addf %72, %75 : vector<4x1xf32>
      %c0_47 = arith.constant 0 : index
      %c0_48 = arith.constant 0 : index
      %77 = vector.load %arg14[%c0_47, %c0_48] : memref<4x1xf32, #tpu.memory_space<vmem>>, vector<4x1xf32>
      tpu.vector_store %arg14[%c0_47, %c0_48], %76 {strides = array<i32>} : memref<4x1xf32, #tpu.memory_space<vmem>>, vector<4x1xf32>,
      %78 = vector.extract_strided_slice %15 {offsets = [0, 19], sizes = [4, 288], strides = [1, 1]} : vector<4x326xf32> to vector<4x288xf32>
      %79 = arith.index_cast %arg1 : i32 to index
      %c0_49 = arith.constant 0 : index
      %c0_50 = arith.constant 0 : index
      %80 = vector.load %arg19[%79, %c0_49, %c0_50] : memref<2x4x288xf32, #tpu.memory_space<vmem>>, vector<1x4x288xf32>
      %81 = vector.shape_cast %80 : vector<1x4x288xf32> to vector<4x288xf32>
      %82 = vector.shape_cast %78 : vector<4x288xf32> to vector<1x4x288xf32>
      tpu.vector_store %arg19[%79, %c0_49, %c0_50], %82 {strides = array<i32>} : memref<2x4x288xf32, #tpu.memory_space<vmem>>, vector<1x4x288xf32>,
    } else {
    }
    %c1_i32 = arith.constant 1 : i32
    %8 = arith.cmpi eq, %arg0, %c1_i32 : i32
    %9 = arith.extui %8 : i1 to i32
    %c0_i32_4 = arith.constant 0 : i32
    %10 = arith.cmpi ne, %9, %c0_i32_4 : i32
    scf.if %10 {
      %c0_i32_6 = arith.constant 0 : i32
      %14 = arith.cmpi eq, %arg1, %c0_i32_6 : i32
      %15 = arith.extui %14 : i1 to i32
      %c0_i32_7 = arith.constant 0 : i32
      %16 = arith.cmpi ne, %15, %c0_i32_7 : i32
      scf.if %16 {
        %c0_59 = arith.constant 0 : index
        %c0_60 = arith.constant 0 : index
        %93 = vector.load %arg13[%c0_59, %c0_60] : memref<4x1xf32, #tpu.memory_space<vmem>>, vector<4x1xf32>
        %cst_61 = arith.constant 0.001953125 : f32
        %94 = vector.broadcast %cst_61 : f32 to vector<4x1xf32>
        %95 = arith.mulf %93, %94 : vector<4x1xf32>
        %c0_62 = arith.constant 0 : index
        %c0_63 = arith.constant 0 : index
        %96 = vector.load %arg14[%c0_62, %c0_63] : memref<4x1xf32, #tpu.memory_space<vmem>>, vector<4x1xf32>
        %cst_64 = arith.constant 0.001953125 : f32
        %97 = vector.broadcast %cst_64 : f32 to vector<4x1xf32>
        %98 = arith.mulf %96, %97 : vector<4x1xf32>
        %99 = arith.mulf %95, %95 : vector<4x1xf32>
        %100 = arith.subf %98, %99 : vector<4x1xf32>
        %c0_65 = arith.constant 0 : index
        %c0_66 = arith.constant 0 : index
        %101 = vector.load %arg4[%c0_65, %c0_66] : memref<4x1xf32, #tpu.memory_space<vmem>>, vector<4x1xf32>
        %cst_67 = arith.constant 9.99999974E-6 : f32
        %102 = vector.broadcast %cst_67 : f32 to vector<4x1xf32>
        %103 = arith.addf %100, %102 : vector<4x1xf32>
        %104 = math.rsqrt %103 : vector<4x1xf32>
        %105 = arith.mulf %101, %104 : vector<4x1xf32>
        %c0_68 = arith.constant 0 : index
        %c0_69 = arith.constant 0 : index
        %106 = vector.load %arg5[%c0_68, %c0_69] : memref<4x1xf32, #tpu.memory_space<vmem>>, vector<4x1xf32>
        %107 = arith.mulf %95, %105 : vector<4x1xf32>
        %108 = arith.subf %106, %107 : vector<4x1xf32>
        %c0_70 = arith.constant 0 : index
        %c0_71 = arith.constant 0 : index
        %109 = vector.load %arg9[%c0_70, %c0_71] : memref<1x288xf32, #tpu.memory_space<vmem>>, vector<1x288xf32>
        %110 = vector.broadcast %105 : vector<4x1xf32> to vector<4x288xf32>
        %111 = vector.broadcast %109 : vector<1x288xf32> to vector<4x288xf32>
        %112 = arith.mulf %110, %111 : vector<4x288xf32>
        %c0_72 = arith.constant 0 : index
        %c0_73 = arith.constant 0 : index
        %c0_74 = arith.constant 0 : index
        %113 = vector.load %arg17[%c0_72, %c0_73, %c0_74] : memref<2x4x288xf32, #tpu.memory_space<vmem>>, vector<1x4x288xf32>
        %114 = vector.shape_cast %113 : vector<1x4x288xf32> to vector<4x288xf32>
        %115 = vector.shape_cast %112 : vector<4x288xf32> to vector<1x4x288xf32>
        tpu.vector_store %arg17[%c0_72, %c0_73, %c0_74], %115 {strides = array<i32>} : memref<2x4x288xf32, #tpu.memory_space<vmem>>, vector<1x4x288xf32>,
        %c0_75 = arith.constant 0 : index
        %c0_76 = arith.constant 0 : index
        %116 = vector.load %arg9[%c0_75, %c0_76] : memref<1x288xf32, #tpu.memory_space<vmem>>, vector<1x288xf32>
        %117 = vector.broadcast %108 : vector<4x1xf32> to vector<4x288xf32>
        %118 = vector.broadcast %116 : vector<1x288xf32> to vector<4x288xf32>
        %119 = arith.mulf %117, %118 : vector<4x288xf32>
        %c1_77 = arith.constant 1 : index
        %c0_78 = arith.constant 0 : index
        %c0_79 = arith.constant 0 : index
        %120 = vector.load %arg17[%c1_77, %c0_78, %c0_79] : memref<2x4x288xf32, #tpu.memory_space<vmem>>, vector<1x4x288xf32>
        %121 = vector.shape_cast %120 : vector<1x4x288xf32> to vector<4x288xf32>
        %122 = vector.shape_cast %119 : vector<4x288xf32> to vector<1x4x288xf32>
        tpu.vector_store %arg17[%c1_77, %c0_78, %c0_79], %122 {strides = array<i32>} : memref<2x4x288xf32, #tpu.memory_space<vmem>>, vector<1x4x288xf32>,
      } else {
      }
      %17 = arith.index_cast %arg1 : i32 to index
      %c0 = arith.constant 0 : index
      %c0_8 = arith.constant 0 : index
      %18 = vector.load %arg11[%17, %c0, %c0_8] : memref<2x4x288xf32, #tpu.memory_space<vmem>>, vector<1x4x288xf32>
      %19 = vector.shape_cast %18 : vector<1x4x288xf32> to vector<4x288xf32>
      %c0_9 = arith.constant 0 : index
      %c0_10 = arith.constant 0 : index
      %c0_11 = arith.constant 0 : index
      %20 = vector.load %arg17[%c0_9, %c0_10, %c0_11] : memref<2x4x288xf32, #tpu.memory_space<vmem>>, vector<1x4x288xf32>
      %21 = vector.shape_cast %20 : vector<1x4x288xf32> to vector<4x288xf32>
      %22 = arith.mulf %19, %21 : vector<4x288xf32>
      %c1 = arith.constant 1 : index
      %c0_12 = arith.constant 0 : index
      %c0_13 = arith.constant 0 : index
      %23 = vector.load %arg17[%c1, %c0_12, %c0_13] : memref<2x4x288xf32, #tpu.memory_space<vmem>>, vector<1x4x288xf32>
      %24 = vector.shape_cast %23 : vector<1x4x288xf32> to vector<4x288xf32>
      %25 = arith.addf %22, %24 : vector<4x288xf32>
      %cst = arith.constant 0.000000e+00 : f32
      %26 = vector.broadcast %cst : f32 to vector<4x288xf32>
      %27 = arith.maximumf %25, %26 : vector<4x288xf32>
      %cst_14 = arith.constant 0.000000e+00 : f32
      %28 = vector.broadcast %cst_14 : f32 to vector<4x19xf32>
      %cst_15 = arith.constant 0.000000e+00 : f32
      %29 = vector.broadcast %cst_15 : f32 to vector<4x19xf32>
      %30 = tpu.concatenate %28, %27, %29 in 1 : vector<4x19xf32>, vector<4x288xf32>, vector<4x19xf32> -> vector<4x326xf32>
      %c0_16 = arith.constant 0 : index
      %c0_17 = arith.constant 0 : index
      %c0_18 = arith.constant 0 : index
      %31 = vector.load %arg6[%c0_16, %c0_17, %c0_18] : memref<9x4x4xf32, #tpu.memory_space<vmem>>, vector<1x4x4xf32>
      %32 = vector.shape_cast %31 : vector<1x4x4xf32> to vector<4x4xf32>
      %33 = vector.extract_strided_slice %30 {offsets = [0, 0], sizes = [4, 288], strides = [1, 1]} : vector<4x326xf32> to vector<4x288xf32>
      %cst_19 = arith.constant dense<0.000000e+00> : vector<4x288xf32>
      %34 = tpu.matmul %32, %33, %cst_19 {dimension_numbers = #tpu.dot_dimension_numbers<[1], [0], [0], [1], [0, 0, 1, 1], [], []>} : vector<4x4xf32>, vector<4x288xf32>, vector<4x288xf32> -> vector<4x288xf32>
      %c1_20 = arith.constant 1 : index
      %c0_21 = arith.constant 0 : index
      %c0_22 = arith.constant 0 : index
      %35 = vector.load %arg6[%c1_20, %c0_21, %c0_22] : memref<9x4x4xf32, #tpu.memory_space<vmem>>, vector<1x4x4xf32>
      %36 = vector.shape_cast %35 : vector<1x4x4xf32> to vector<4x4xf32>
      %37 = vector.extract_strided_slice %30 {offsets = [0, 1], sizes = [4, 288], strides = [1, 1]} : vector<4x326xf32> to vector<4x288xf32>
      %cst_23 = arith.constant dense<0.000000e+00> : vector<4x288xf32>
      %38 = tpu.matmul %36, %37, %cst_23 {dimension_numbers = #tpu.dot_dimension_numbers<[1], [0], [0], [1], [0, 0, 1, 1], [], []>} : vector<4x4xf32>, vector<4x288xf32>, vector<4x288xf32> -> vector<4x288xf32>
      %39 = arith.addf %34, %38 : vector<4x288xf32>
      %c2 = arith.constant 2 : index
      %c0_24 = arith.constant 0 : index
      %c0_25 = arith.constant 0 : index
      %40 = vector.load %arg6[%c2, %c0_24, %c0_25] : memref<9x4x4xf32, #tpu.memory_space<vmem>>, vector<1x4x4xf32>
      %41 = vector.shape_cast %40 : vector<1x4x4xf32> to vector<4x4xf32>
      %42 = vector.extract_strided_slice %30 {offsets = [0, 2], sizes = [4, 288], strides = [1, 1]} : vector<4x326xf32> to vector<4x288xf32>
      %cst_26 = arith.constant dense<0.000000e+00> : vector<4x288xf32>
      %43 = tpu.matmul %41, %42, %cst_26 {dimension_numbers = #tpu.dot_dimension_numbers<[1], [0], [0], [1], [0, 0, 1, 1], [], []>} : vector<4x4xf32>, vector<4x288xf32>, vector<4x288xf32> -> vector<4x288xf32>
      %44 = arith.addf %39, %43 : vector<4x288xf32>
      %c3 = arith.constant 3 : index
      %c0_27 = arith.constant 0 : index
      %c0_28 = arith.constant 0 : index
      %45 = vector.load %arg6[%c3, %c0_27, %c0_28] : memref<9x4x4xf32, #tpu.memory_space<vmem>>, vector<1x4x4xf32>
      %46 = vector.shape_cast %45 : vector<1x4x4xf32> to vector<4x4xf32>
      %47 = vector.extract_strided_slice %30 {offsets = [0, 18], sizes = [4, 288], strides = [1, 1]} : vector<4x326xf32> to vector<4x288xf32>
      %cst_29 = arith.constant dense<0.000000e+00> : vector<4x288xf32>
      %48 = tpu.matmul %46, %47, %cst_29 {dimension_numbers = #tpu.dot_dimension_numbers<[1], [0], [0], [1], [0, 0, 1, 1], [], []>} : vector<4x4xf32>, vector<4x288xf32>, vector<4x288xf32> -> vector<4x288xf32>
      %49 = arith.addf %44, %48 : vector<4x288xf32>
      %c4 = arith.constant 4 : index
      %c0_30 = arith.constant 0 : index
      %c0_31 = arith.constant 0 : index
      %50 = vector.load %arg6[%c4, %c0_30, %c0_31] : memref<9x4x4xf32, #tpu.memory_space<vmem>>, vector<1x4x4xf32>
      %51 = vector.shape_cast %50 : vector<1x4x4xf32> to vector<4x4xf32>
      %52 = vector.extract_strided_slice %30 {offsets = [0, 19], sizes = [4, 288], strides = [1, 1]} : vector<4x326xf32> to vector<4x288xf32>
      %cst_32 = arith.constant dense<0.000000e+00> : vector<4x288xf32>
      %53 = tpu.matmul %51, %52, %cst_32 {dimension_numbers = #tpu.dot_dimension_numbers<[1], [0], [0], [1], [0, 0, 1, 1], [], []>} : vector<4x4xf32>, vector<4x288xf32>, vector<4x288xf32> -> vector<4x288xf32>
      %54 = arith.addf %49, %53 : vector<4x288xf32>
      %c5 = arith.constant 5 : index
      %c0_33 = arith.constant 0 : index
      %c0_34 = arith.constant 0 : index
      %55 = vector.load %arg6[%c5, %c0_33, %c0_34] : memref<9x4x4xf32, #tpu.memory_space<vmem>>, vector<1x4x4xf32>
      %56 = vector.shape_cast %55 : vector<1x4x4xf32> to vector<4x4xf32>
      %57 = vector.extract_strided_slice %30 {offsets = [0, 20], sizes = [4, 288], strides = [1, 1]} : vector<4x326xf32> to vector<4x288xf32>
      %cst_35 = arith.constant dense<0.000000e+00> : vector<4x288xf32>
      %58 = tpu.matmul %56, %57, %cst_35 {dimension_numbers = #tpu.dot_dimension_numbers<[1], [0], [0], [1], [0, 0, 1, 1], [], []>} : vector<4x4xf32>, vector<4x288xf32>, vector<4x288xf32> -> vector<4x288xf32>
      %59 = arith.addf %54, %58 : vector<4x288xf32>
      %c6 = arith.constant 6 : index
      %c0_36 = arith.constant 0 : index
      %c0_37 = arith.constant 0 : index
      %60 = vector.load %arg6[%c6, %c0_36, %c0_37] : memref<9x4x4xf32, #tpu.memory_space<vmem>>, vector<1x4x4xf32>
      %61 = vector.shape_cast %60 : vector<1x4x4xf32> to vector<4x4xf32>
      %62 = vector.extract_strided_slice %30 {offsets = [0, 36], sizes = [4, 288], strides = [1, 1]} : vector<4x326xf32> to vector<4x288xf32>
      %cst_38 = arith.constant dense<0.000000e+00> : vector<4x288xf32>
      %63 = tpu.matmul %61, %62, %cst_38 {dimension_numbers = #tpu.dot_dimension_numbers<[1], [0], [0], [1], [0, 0, 1, 1], [], []>} : vector<4x4xf32>, vector<4x288xf32>, vector<4x288xf32> -> vector<4x288xf32>
      %64 = arith.addf %59, %63 : vector<4x288xf32>
      %c7 = arith.constant 7 : index
      %c0_39 = arith.constant 0 : index
      %c0_40 = arith.constant 0 : index
      %65 = vector.load %arg6[%c7, %c0_39, %c0_40] : memref<9x4x4xf32, #tpu.memory_space<vmem>>, vector<1x4x4xf32>
      %66 = vector.shape_cast %65 : vector<1x4x4xf32> to vector<4x4xf32>
      %67 = vector.extract_strided_slice %30 {offsets = [0, 37], sizes = [4, 288], strides = [1, 1]} : vector<4x326xf32> to vector<4x288xf32>
      %cst_41 = arith.constant dense<0.000000e+00> : vector<4x288xf32>
      %68 = tpu.matmul %66, %67, %cst_41 {dimension_numbers = #tpu.dot_dimension_numbers<[1], [0], [0], [1], [0, 0, 1, 1], [], []>} : vector<4x4xf32>, vector<4x288xf32>, vector<4x288xf32> -> vector<4x288xf32>
      %69 = arith.addf %64, %68 : vector<4x288xf32>
      %c8 = arith.constant 8 : index
      %c0_42 = arith.constant 0 : index
      %c0_43 = arith.constant 0 : index
      %70 = vector.load %arg6[%c8, %c0_42, %c0_43] : memref<9x4x4xf32, #tpu.memory_space<vmem>>, vector<1x4x4xf32>
      %71 = vector.shape_cast %70 : vector<1x4x4xf32> to vector<4x4xf32>
      %72 = vector.extract_strided_slice %30 {offsets = [0, 38], sizes = [4, 288], strides = [1, 1]} : vector<4x326xf32> to vector<4x288xf32>
      %cst_44 = arith.constant dense<0.000000e+00> : vector<4x288xf32>
      %73 = tpu.matmul %71, %72, %cst_44 {dimension_numbers = #tpu.dot_dimension_numbers<[1], [0], [0], [1], [0, 0, 1, 1], [], []>} : vector<4x4xf32>, vector<4x288xf32>, vector<4x288xf32> -> vector<4x288xf32>
      %74 = arith.addf %69, %73 : vector<4x288xf32>
      %c0_45 = arith.constant 0 : index
      %c0_46 = arith.constant 0 : index
      %75 = vector.load %arg9[%c0_45, %c0_46] : memref<1x288xf32, #tpu.memory_space<vmem>>, vector<1x288xf32>
      %76 = vector.broadcast %75 : vector<1x288xf32> to vector<4x288xf32>
      %77 = arith.mulf %74, %76 : vector<4x288xf32>
      %78 = arith.index_cast %arg1 : i32 to index
      %c0_47 = arith.constant 0 : index
      %c0_48 = arith.constant 0 : index
      %79 = vector.load %arg12[%78, %c0_47, %c0_48] : memref<2x4x288xf32, #tpu.memory_space<vmem>>, vector<1x4x288xf32>
      %80 = vector.shape_cast %79 : vector<1x4x288xf32> to vector<4x288xf32>
      %81 = vector.shape_cast %77 : vector<4x288xf32> to vector<1x4x288xf32>
      tpu.vector_store %arg12[%78, %c0_47, %c0_48], %81 {strides = array<i32>} : memref<2x4x288xf32, #tpu.memory_space<vmem>>, vector<1x4x288xf32>,
      %c0_49 = arith.constant 0 : index
      %c0_50 = arith.constant 0 : index
      %82 = vector.load %arg15[%c0_49, %c0_50] : memref<4x1xf32, #tpu.memory_space<vmem>>, vector<4x1xf32>
      %cst_51 = arith.constant dense<0.000000e+00> : vector<4xf32>
      %83 = vector.multi_reduction <add>, %77, %cst_51 [1] : vector<4x288xf32> to vector<4xf32>
      %84 = vector.shape_cast %83 : vector<4xf32> to vector<4x1xf32>
      %85 = arith.addf %82, %84 : vector<4x1xf32>
      %c0_52 = arith.constant 0 : index
      %c0_53 = arith.constant 0 : index
      %86 = vector.load %arg15[%c0_52, %c0_53] : memref<4x1xf32, #tpu.memory_space<vmem>>, vector<4x1xf32>
      tpu.vector_store %arg15[%c0_52, %c0_53], %85 {strides = array<i32>} : memref<4x1xf32, #tpu.memory_space<vmem>>, vector<4x1xf32>,
      %c0_54 = arith.constant 0 : index
      %c0_55 = arith.constant 0 : index
      %87 = vector.load %arg16[%c0_54, %c0_55] : memref<4x1xf32, #tpu.memory_space<vmem>>, vector<4x1xf32>
      %88 = arith.mulf %77, %77 : vector<4x288xf32>
      %cst_56 = arith.constant dense<0.000000e+00> : vector<4xf32>
      %89 = vector.multi_reduction <add>, %88, %cst_56 [1] : vector<4x288xf32> to vector<4xf32>
      %90 = vector.shape_cast %89 : vector<4xf32> to vector<4x1xf32>
      %91 = arith.addf %87, %90 : vector<4x1xf32>
      %c0_57 = arith.constant 0 : index
      %c0_58 = arith.constant 0 : index
      %92 = vector.load %arg16[%c0_57, %c0_58] : memref<4x1xf32, #tpu.memory_space<vmem>>, vector<4x1xf32>
      tpu.vector_store %arg16[%c0_57, %c0_58], %91 {strides = array<i32>} : memref<4x1xf32, #tpu.memory_space<vmem>>, vector<4x1xf32>,
    } else {
    }
    %c2_i32 = arith.constant 2 : i32
    %11 = arith.cmpi eq, %arg0, %c2_i32 : i32
    %12 = arith.extui %11 : i1 to i32
    %c0_i32_5 = arith.constant 0 : i32
    %13 = arith.cmpi ne, %12, %c0_i32_5 : i32
    scf.if %13 {
      %c0_i32_6 = arith.constant 0 : i32
      %14 = arith.cmpi eq, %arg1, %c0_i32_6 : i32
      %15 = arith.extui %14 : i1 to i32
      %c0_i32_7 = arith.constant 0 : i32
      %16 = arith.cmpi ne, %15, %c0_i32_7 : i32
      scf.if %16 {
        %c0_19 = arith.constant 0 : index
        %c0_20 = arith.constant 0 : index
        %35 = vector.load %arg15[%c0_19, %c0_20] : memref<4x1xf32, #tpu.memory_space<vmem>>, vector<4x1xf32>
        %cst_21 = arith.constant 0.001953125 : f32
        %36 = vector.broadcast %cst_21 : f32 to vector<4x1xf32>
        %37 = arith.mulf %35, %36 : vector<4x1xf32>
        %c0_22 = arith.constant 0 : index
        %c0_23 = arith.constant 0 : index
        %38 = vector.load %arg16[%c0_22, %c0_23] : memref<4x1xf32, #tpu.memory_space<vmem>>, vector<4x1xf32>
        %cst_24 = arith.constant 0.001953125 : f32
        %39 = vector.broadcast %cst_24 : f32 to vector<4x1xf32>
        %40 = arith.mulf %38, %39 : vector<4x1xf32>
        %41 = arith.mulf %37, %37 : vector<4x1xf32>
        %42 = arith.subf %40, %41 : vector<4x1xf32>
        %c0_25 = arith.constant 0 : index
        %c0_26 = arith.constant 0 : index
        %43 = vector.load %arg7[%c0_25, %c0_26] : memref<4x1xf32, #tpu.memory_space<vmem>>, vector<4x1xf32>
        %cst_27 = arith.constant 9.99999974E-6 : f32
        %44 = vector.broadcast %cst_27 : f32 to vector<4x1xf32>
        %45 = arith.addf %42, %44 : vector<4x1xf32>
        %46 = math.rsqrt %45 : vector<4x1xf32>
        %47 = arith.mulf %43, %46 : vector<4x1xf32>
        %c0_28 = arith.constant 0 : index
        %c0_29 = arith.constant 0 : index
        %48 = vector.load %arg8[%c0_28, %c0_29] : memref<4x1xf32, #tpu.memory_space<vmem>>, vector<4x1xf32>
        %49 = arith.mulf %37, %47 : vector<4x1xf32>
        %50 = arith.subf %48, %49 : vector<4x1xf32>
        %51 = vector.shape_cast %47 : vector<4x1xf32> to vector<4x1xf32>
        %52 = vector.broadcast %51 : vector<4x1xf32> to vector<4x288xf32>
        %c0_30 = arith.constant 0 : index
        %c0_31 = arith.constant 0 : index
        %c0_32 = arith.constant 0 : index
        %53 = vector.load %arg18[%c0_30, %c0_31, %c0_32] : memref<2x4x288xf32, #tpu.memory_space<vmem>>, vector<1x4x288xf32>
        %54 = vector.shape_cast %53 : vector<1x4x288xf32> to vector<4x288xf32>
        %55 = vector.shape_cast %52 : vector<4x288xf32> to vector<1x4x288xf32>
        tpu.vector_store %arg18[%c0_30, %c0_31, %c0_32], %55 {strides = array<i32>} : memref<2x4x288xf32, #tpu.memory_space<vmem>>, vector<1x4x288xf32>,
        %56 = vector.shape_cast %50 : vector<4x1xf32> to vector<4x1xf32>
        %57 = vector.broadcast %56 : vector<4x1xf32> to vector<4x288xf32>
        %c1_33 = arith.constant 1 : index
        %c0_34 = arith.constant 0 : index
        %c0_35 = arith.constant 0 : index
        %58 = vector.load %arg18[%c1_33, %c0_34, %c0_35] : memref<2x4x288xf32, #tpu.memory_space<vmem>>, vector<1x4x288xf32>
        %59 = vector.shape_cast %58 : vector<1x4x288xf32> to vector<4x288xf32>
        %60 = vector.shape_cast %57 : vector<4x288xf32> to vector<1x4x288xf32>
        tpu.vector_store %arg18[%c1_33, %c0_34, %c0_35], %60 {strides = array<i32>} : memref<2x4x288xf32, #tpu.memory_space<vmem>>, vector<1x4x288xf32>,
      } else {
      }
      %17 = arith.index_cast %arg1 : i32 to index
      %c0 = arith.constant 0 : index
      %c0_8 = arith.constant 0 : index
      %18 = vector.load %arg12[%17, %c0, %c0_8] : memref<2x4x288xf32, #tpu.memory_space<vmem>>, vector<1x4x288xf32>
      %19 = vector.shape_cast %18 : vector<1x4x288xf32> to vector<4x288xf32>
      %c0_9 = arith.constant 0 : index
      %c0_10 = arith.constant 0 : index
      %c0_11 = arith.constant 0 : index
      %20 = vector.load %arg18[%c0_9, %c0_10, %c0_11] : memref<2x4x288xf32, #tpu.memory_space<vmem>>, vector<1x4x288xf32>
      %21 = vector.shape_cast %20 : vector<1x4x288xf32> to vector<4x288xf32>
      %22 = arith.mulf %19, %21 : vector<4x288xf32>
      %c1 = arith.constant 1 : index
      %c0_12 = arith.constant 0 : index
      %c0_13 = arith.constant 0 : index
      %23 = vector.load %arg18[%c1, %c0_12, %c0_13] : memref<2x4x288xf32, #tpu.memory_space<vmem>>, vector<1x4x288xf32>
      %24 = vector.shape_cast %23 : vector<1x4x288xf32> to vector<4x288xf32>
      %25 = arith.addf %22, %24 : vector<4x288xf32>
      %26 = arith.index_cast %arg1 : i32 to index
      %c0_14 = arith.constant 0 : index
      %c0_15 = arith.constant 0 : index
      %27 = vector.load %arg19[%26, %c0_14, %c0_15] : memref<2x4x288xf32, #tpu.memory_space<vmem>>, vector<1x4x288xf32>
      %28 = vector.shape_cast %27 : vector<1x4x288xf32> to vector<4x288xf32>
      %29 = arith.addf %25, %28 : vector<4x288xf32>
      %cst = arith.constant 0.000000e+00 : f32
      %30 = vector.broadcast %cst : f32 to vector<4x288xf32>
      %31 = arith.maximumf %29, %30 : vector<4x288xf32>
      %c0_16 = arith.constant 0 : index
      %c0_17 = arith.constant 0 : index
      %c0_18 = arith.constant 0 : index
      %32 = vector.load %arg10[%c0_16, %c0_17, %c0_18] : memref<1x4x288xf32, #tpu.memory_space<vmem>>, vector<1x4x288xf32>
      %33 = vector.shape_cast %32 : vector<1x4x288xf32> to vector<4x288xf32>
      %34 = vector.shape_cast %31 : vector<4x288xf32> to vector<1x4x288xf32>
      tpu.vector_store %arg10[%c0_16, %c0_17, %c0_18], %34 {strides = array<i32>} : memref<1x4x288xf32, #tpu.memory_space<vmem>>, vector<1x4x288xf32>,
    } else {
    }
    return
  }
  func.func @transform_0(%arg0: i32, %arg1: i32) -> (i32, i32, i32) {
    %c0_i32 = arith.constant 0 : i32
    %0 = arith.cmpi eq, %arg0, %c0_i32 : i32
    %c1_i32 = arith.constant 1 : i32
    %1 = arith.select %0, %arg1, %c1_i32 : i32
    %c0_i32_0 = arith.constant 0 : i32
    %c0_i32_1 = arith.constant 0 : i32
    %c0_i32_2 = arith.constant 0 : i32
    return %1, %c0_i32_0, %c0_i32_1 : i32, i32, i32
  }
  func.func @transform_1(%arg0: i32, %arg1: i32) -> (i32, i32, i32) {
    %c0_i32 = arith.constant 0 : i32
    %c0_i32_0 = arith.constant 0 : i32
    %c0_i32_1 = arith.constant 0 : i32
    %c0_i32_2 = arith.constant 0 : i32
    return %c0_i32, %c0_i32_0, %c0_i32_1 : i32, i32, i32
  }
  func.func @transform_2(%arg0: i32, %arg1: i32) -> (i32, i32) {
    %c0_i32 = arith.constant 0 : i32
    %c0_i32_0 = arith.constant 0 : i32
    %c0_i32_1 = arith.constant 0 : i32
    return %c0_i32, %c0_i32_0 : i32, i32
  }
  func.func @transform_3(%arg0: i32, %arg1: i32) -> (i32, i32) {
    %c0_i32 = arith.constant 0 : i32
    %c0_i32_0 = arith.constant 0 : i32
    %c0_i32_1 = arith.constant 0 : i32
    return %c0_i32, %c0_i32_0 : i32, i32
  }
  func.func @transform_4(%arg0: i32, %arg1: i32) -> (i32, i32, i32) {
    %c0_i32 = arith.constant 0 : i32
    %c0_i32_0 = arith.constant 0 : i32
    %c0_i32_1 = arith.constant 0 : i32
    %c0_i32_2 = arith.constant 0 : i32
    return %c0_i32, %c0_i32_0, %c0_i32_1 : i32, i32, i32
  }
  func.func @transform_5(%arg0: i32, %arg1: i32) -> (i32, i32) {
    %c0_i32 = arith.constant 0 : i32
    %c0_i32_0 = arith.constant 0 : i32
    %c0_i32_1 = arith.constant 0 : i32
    return %c0_i32, %c0_i32_0 : i32, i32
  }
  func.func @transform_6(%arg0: i32, %arg1: i32) -> (i32, i32) {
    %c0_i32 = arith.constant 0 : i32
    %c0_i32_0 = arith.constant 0 : i32
    %c0_i32_1 = arith.constant 0 : i32
    return %c0_i32, %c0_i32_0 : i32, i32
  }
  func.func @transform_7(%arg0: i32, %arg1: i32) -> (i32, i32) {
    %c0_i32 = arith.constant 0 : i32
    %c0_i32_0 = arith.constant 0 : i32
    %c0_i32_1 = arith.constant 0 : i32
    return %c0_i32, %c0_i32_0 : i32, i32
  }
  func.func @transform_8(%arg0: i32, %arg1: i32) -> (i32, i32, i32) {
    %c2_i32 = arith.constant 2 : i32
    %0 = arith.cmpi eq, %arg0, %c2_i32 : i32
    %c0_i32 = arith.constant 0 : i32
    %1 = arith.select %0, %arg1, %c0_i32 : i32
    %c0_i32_0 = arith.constant 0 : i32
    %c0_i32_1 = arith.constant 0 : i32
    %c0_i32_2 = arith.constant 0 : i32
    return %1, %c0_i32_0, %c0_i32_1 : i32, i32, i32
  }
}

</mosaic_0001>

<bundles_post_ra>
// kernel: tpu_custom_call.1
= control target key start
LH: loop header
LB: loop body
LE: loop exit
PB: predicated region body
PF: predicated region fallthrough
CT: control target
= control target key end

     0   :  { %s4649_s0 = inlined_call_operand.vmem [shape: f32[2,4,326], index: 0, kind: input, shape index: {}]   ;;  %s4650_s1 = inlined_call_operand.vmem [shape: f32[9,4,4], index: 1, kind: input, shape index: {}]   ;;  %s4651_s2 = inlined_call_operand.vmem [shape: f32[4,1], index: 2, kind: input, shape index: {}]   ;;  %s4652_s3 = inlined_call_operand.vmem [shape: f32[4,1], index: 3, kind: input, shape index: {}]   ;;  %s4653_s4 = inlined_call_operand.vmem [shape: f32[9,4,4], index: 4, kind: input, shape index: {}]   ;;  %s4654_s5 = inlined_call_operand.vmem [shape: f32[4,1], index: 5, kind: input, shape index: {}]   ;;  %s4655_s6 = inlined_call_operand.vmem [shape: f32[4,1], index: 6, kind: input, shape index: {}]   ;;  %s4656_s7 = inlined_call_operand.vmem [shape: f32[1,288], index: 7, kind: input, shape index: {}]   ;;  %s4657_s8 = inlined_call_operand.hbm [shape: f32[2,4,288], index: 8, kind: output, shape index: {}]  }
   0x1   :  { %4659 = sst [smem:[#allocation14_spill]] %s4649_s0 }
   0x2   :  { %4660 = sst [smem:[#allocation15_spill]] %s4650_s1 }
   0x3   :  { %4661 = sst [smem:[#allocation16_spill]] %s4651_s2 }
   0x4   :  { %13 = vsyncpa [#allocation12], 0 }
   0x5   :  { %15 = vsyncpa [#allocation12 + $0x1], 0  ;;  %s4218_s27 = smov 0   ;;  %s4220_s28 = smov 0  }
   0x6   :  { %s4222_s29 = smov 0   ;;  %s4224_s30 = smov 0  }
   0x7   :  { %s4226_s9 = smov 0   ;;  %s4228_s10 = smov 0  }
   0x8   :  { %s4230_s11 = smov 0   ;;  %s4232_s12 = smov 0  }
   0x9 LB: > { %s3689_s13 = sadd.s32 4294967295, %s4145_s12   ;;  %s30_s14 = sadd.s32 1, %s4137_s10  ;;  %s4145_s12 = sphi %s4232_s12, %s21_s12   ;;  %s4141_s11 = sphi %s4230_s11, %s4674_s11   ;;  %s4137_s10 = sphi %s4228_s10, %s4673_s10   ;;  %s4133_s9 = sphi %s4226_s9, %s4672_s9   ;;  %s4129_s30 = sphi %s4224_s30, %s4671_s30   ;;  %s4125_s29 = sphi %s4222_s29, %s4670_s29   ;;  %s4121_s28 = sphi %s4220_s28, %s4669_s28   ;;  %s4117_s27 = sphi %s4218_s27, %s4668_s27  }
   0xa   : > { %s33_s15 = sadd.s32 1, %s4141_s11  ;;  %p31_p0 = scmp.ge.s32.totalorder %s30_s14, 2 }
   0xb   : > { %p214_p1 = scmp.eq.s32.totalorder %s4141_s11, 2  ;;  %s3690_s16 = sadd.s32 4294967294, %s4145_s12  }
   0xc   : > { %p231_p2 = scmp.ne.s32.totalorder %s4125_s29, %s4121_s28  ;;  %s4676_s14 = smov (%p31_p0, %s30_s14), 0 }
   0xd   : > { %s4678_s15 = smov (!%p31_p0, %s33_s15), %s4141_s11  ;;  %p232_p4 = scmp.eq.s32.totalorder %s3689_s13, 5 }
   0xe   : > { %s215_s17 = scalar_select %p214_p1, %s4137_s10, 0 }
   0xf   : > { %p35_p3 = scmp.ge.s32.totalorder %s4678_s15, 3  ;;  %p237_p5 = scmp.ne.s32.totalorder %s4121_s28, %s4117_s27 }
  0x10   : > { %p238_p6 = scmp.eq.s32.totalorder %s3690_s16, 5  ;;  %p4273_p7 = por %p232_p4, %p231_p2 }
  0x11   : > { %s4680_s15 = smov (%p35_p3, %s4678_s15), 0  ;;  %p3693_p10 = scmp.ge.s32.totalorder %s4145_s12, 1 }
  0x12   : > { %p4277_p8 = por %p238_p6, %p237_p5  ;;  %p216_p9 = scmp.eq.s32.totalorder %s4680_s15, 2 }
  0x13   : > { %p289_p11 = scmp.lt.s32.totalorder %s4145_s12, 7  ;;  %s221_s22 = sadd.s32 1, %s4125_s29 }
  0x14   : > { %s217_s20 = scalar_select %p216_p9, %s4676_s14, 0 }
  0x15   : > { %p290_p12 = pnand %p3693_p10, %p289_p11 }
  0x16   : > { %s218_s21 = ssub.s32 %s215_s17, %s217_s20  ;;  %s4658_s24 = sand.u32 (!%p290_p12), 1, %s4121_s28  }
  0x17   : > { %p219_p13 = scmp.eq.s32.totalorder %s218_s21, 0  ;;  %293 = sbr.rel (%p290_p12) target bundleno = 1572 (0x624), region = 52 }
  0x18   : > { %p325_p0 = scmp.eq.s32.totalorder (!%p290_p12), %s4133_s9, 0  ;;  %s3947_s25 = smul.u32 (!%p290_p12), 12, %s4658_s24 }
  0x19   : > { %s4287_s23 = scalar_select %p219_p13, %s4125_s29, %s221_s22  }
  0x1a   : > { %p337_p1 = scmp.eq.s32.totalorder (!%p290_p12), %s4129_s30, 0  ;;  %s4664_s0 = sld [smem:[#allocation14_spill]] (!%p290_p12) }
  0x1b   : > { %s4298_s21 = scalar_lea.vmem (!%p290_p12), [#allocation11], %s3947_s25 }
  0x1c   : > { %s326_s26 = scalar_select %p325_p0, %s4129_s30, 1 }
  0x1d   : > { %p338_p2 = pnand %p337_p1, %p325_p0 }
  0x1e   : > { %p327_p3 = scmp.lt.s32.totalorder %s326_s26, 1 }
  0x1f   : > { %341 = sbr.rel (%p338_p2) target bundleno = 39 (0x27), region = 56 }
  0x20   : > { %s4682_s26 = smov (!%p327_p3, %s326_s26), 1 }
  0x21   : > { %s3948_s13 = smul.u32 12, %s4682_s26 }
  0x23   : > { %s331_s20 = scalar_lea.vmem %s4664_s0, %s3948_s13 }
  0x24   : > { %vm342_vm0 = vcmask 3072   ;;  %v4147_v0 = vmov 0.0  }
  0x25   : > { %343 = vst.msk [vmem:[#allocation4] sm:$0xf] %vm342_vm0, %v4147_v0  ;;  %344 = vst.msk [vmem:[#allocation5] sm:$0xf] %vm342_vm0, %v4147_v0 }
  0x26   : > { %345 = vst.msk [vmem:[#allocation6] sm:$0xf] %vm342_vm0, %v4147_v0  ;;  %346 = vst.msk [vmem:[#allocation7] sm:$0xf] %vm342_vm0, %v4147_v0 }
  0x27 PF: > { %p3695_p4 = scmp.ne.s32.totalorder %s4133_s9, 0 }
  0x28   : > { %s4148_s22 = smov (!%p3695_p4), 127   ;;  %s4151_s25 = smov (!%p3695_p4), 126  }
  0x29   : > { %349 = sbr.rel (%p3695_p4) target bundleno = 558 (0x22e), region = 60  ;;  %s4152_s26 = smov (!%p3695_p4), 110  }
  0x2a   : > { %s4153_s13 = smov (!%p3695_p4), 109   ;;  %s4154_s16 = smov (!%p3695_p4), 108  }
  0x2b   : > { %s4155_s17 = smov (!%p3695_p4), 92   ;;  %s4665_s1 = sld [smem:[#allocation15_spill]] (!%p3695_p4) }
  0x2e   : > { %v4301_v1 = vld [vmem:[%s331_s20] sm:$0xff]  ;;  %v4149_v3 = vmov 0.0   ;;  %vm4150_vm1 = vmmov 0   ;;  %v351_v4 = vld [vmem:[%s331_s20 + $0x8] sm:$0xf]  ;;  %s4156_s20 = smov 91  }
  0x2f   : > { %358 = vrot.lane.b32.xlu1 %v4301_v1, %s4148_s22  ;;  %v357_v2 = vcombine.high %v4301_v1, %v4301_v1  ;;  %3857 = vmatprep.subr.mxu1 %v4149_v3  ;;  %vm371_vm2 = vcmask 1043456   ;;  %vm364_vm3 = vcmask 1039360   ;;  %vm367_vm4 = vcmask 31744  }
  0x30   : > { %3859 = vmatprep.mubr.msk.f32.mxu1 %vm4150_vm1, %v4149_v3  ;;  %442 = vmatprep.mubr.f32.mxu0 %v4149_v3  ;;  %vm677_vm5 = vcmask 1031168   ;;  %vm841_vm6 = vcmask 900096   ;;  %vm1845_vm7 = vcmask 257024   ;;  %vm1005_vm8 = vcmask 891904  }
  0x31   : > { %360 = vrot.lane.b32.xlu0 %v357_v2, %s4148_s22  ;;  %v3696_v8 = vld [vmem:[%s4665_s1 + $0x4] sm:$0xf]  ;;  %v352_v14 = vld [vmem:[%s4665_s1] sm:$0xf]  ;;  %v3707_v18 = vld [vmem:[%s4665_s1 + $0x8] sm:$0xf] }
  0x32   : > { %v3713_v23 = vld [vmem:[%s4665_s1 + $0xc] sm:$0xf]  ;;  %v3719_v30 = vld [vmem:[%s4665_s1 + $0x10] sm:$0xf]  ;;  %vm1169_vm9 = vcmask 883712   ;;  %vm1333_vm10 = vcmask 752640  }
  0x33   : > { %673 = vrot.lane.b32.xlu1 %v357_v2, %s4151_s25  ;;  %v3725_v37 = vld [vmem:[%s4665_s1 + $0x14] sm:$0xf]  ;;  %v3731_v42 = vld [vmem:[%s4665_s1 + $0x18] sm:$0xf]  ;;  %vm1497_vm11 = vcmask 744448   ;;  %vm1661_vm12 = vcmask 736256  }
  0x34   : > { %v3737_v47 = vld [vmem:[%s4665_s1 + $0x1c] sm:$0xf]  ;;  %v3743_v54 = vld [vmem:[%s4665_s1 + $0x20] sm:$0xf]  ;;  %vm1856_vm13 = vcmask 3072  }
  0x35   : > { %362 = vrot.lane.b32.xlu0 %v351_v4, %s4148_s22  ;;  %s4157_s22 = smov 90  }
  0x37   : > { %671 = vrot.lane.b32.xlu1 %v4301_v1, %s4151_s25 }
  0x39   : > { %675 = vrot.lane.b32.xlu0 %v351_v4, %s4151_s25 }
  0x3b   : > { %839 = vrot.lane.b32.xlu1 %v351_v4, %s4152_s26 }
  0x3d   : > { %837 = vrot.lane.b32.xlu0 %v357_v2, %s4152_s26 }
  0x3f   : > { %1001 = vrot.lane.b32.xlu1 %v357_v2, %s4153_s13 }
  0x41   : > { %835 = vrot.lane.b32.xlu0 %v4301_v1, %s4152_s26 }
  0x43   : > { %999 = vrot.lane.b32.xlu1 %v4301_v1, %s4153_s13 }
  0x45   : > { %1003 = vrot.lane.b32.xlu0 %v351_v4, %s4153_s13 }
  0x47   : > { %1167 = vrot.lane.b32.xlu1 %v351_v4, %s4154_s16 }
  0x49   : > { %1165 = vrot.lane.b32.xlu0 %v357_v2, %s4154_s16 }
  0x4b   : > { %1329 = vrot.lane.b32.xlu1 %v357_v2, %s4155_s17 }
  0x4d   : > { %1163 = vrot.lane.b32.xlu0 %v4301_v1, %s4154_s16 }
  0x4f   : > { %1327 = vrot.lane.b32.xlu1 %v4301_v1, %s4155_s17 }
  0x51   : > { %1331 = vrot.lane.b32.xlu0 %v351_v4, %s4155_s17 }
  0x53   : > { %1495 = vrot.lane.b32.xlu1 %v351_v4, %s4156_s20 }
  0x55   : > { %1493 = vrot.lane.b32.xlu0 %v357_v2, %s4156_s20 }
  0x57   : > { %1657 = vrot.lane.b32.xlu1 %v357_v2, %s4157_s22 }
  0x59   : > { %1491 = vrot.lane.b32.xlu0 %v4301_v1, %s4156_s20 }
  0x5b   : > { %1655 = vrot.lane.b32.xlu1 %v4301_v1, %s4157_s22 }
  0x5d   : > { %1659 = vrot.lane.b32.xlu0 %v351_v4, %s4157_s22  ;;  %s3815_s22 = smul.u32 12, %s4129_s30 }
  0x5f   : > { %s1878_s13 = scalar_lea.vmem [#allocation10], %s3815_s22  ;;  %s1843_s16 = scalar_lea.vmem [#allocation2], %s3815_s22 }
  0xa1   : > { %v359_v5 = vpop.permute.xlu1 %358 }
  0xa3   : > { %v361_v6 = vpop.permute.xlu0 %360 }
  0xa4   : > { %v365_v12 = vsel %vm364_vm3, %v359_v5, %v361_v6 }
  0xa5   : > { %v674_v7 = vpop.permute.xlu1 %673 }
  0xa7   : > { %v363_v9 = vpop.permute.xlu0 %362 }
  0xa8   : > { %3858 = vmatpush3.msk.msra.mxu1 %vm371_vm2, %v363_v9  ;;  %v366_v10 = vsel %vm364_vm3, %v361_v6, %v363_v9 }
  0xa9   : > { %v672_v11 = vpop.permute.xlu1 %671  ;;  %3697 = vmatprep.subr.msk.mxu0 %vm371_vm2, %v366_v10  ;;  %3860 = vmatmul.mubr.msk.f32.vlgmr.msra.gmra.mxu1 %vm367_vm4, %v3696_v8 }
  0xaa   : > { %3698 = vmatpush1.msk.msra.mxu0 %vm371_vm2, %v365_v12  ;;  %3862 = vmatprep.subr.mxu1 %v4149_v3  ;;  %v678_v19 = vsel %vm677_vm5, %v672_v11, %v674_v7 }
  0xab   : > { %3699 = vmatmul.mubr.msk.f32.vlgmr.msra.gmra.mxu0 %vm367_vm4, %v3696_v8  ;;  %3702 = vmatprep.subr.msk.mxu0 %vm371_vm2, %v357_v2  ;;  %v676_v13 = vpop.permute.xlu0 %675 }
  0xac   : > { %3863 = vmatpush3.msk.msra.mxu1 %vm371_vm2, %v351_v4  ;;  %v679_v15 = vsel %vm677_vm5, %v674_v7, %v676_v13  ;;  %3703 = vmatpush1.msk.msra.mxu0 %vm371_vm2, %v4301_v1 }
  0xad   : > { %3864 = vmatprep.mubr.msk.f32.mxu1 %vm4150_vm1, %v4149_v3  ;;  %3867 = vmatprep.subr.mxu1 %v4149_v3  ;;  %v840_v16 = vpop.permute.xlu1 %839 }
  0xae   : > { %3865 = vmatmul.mubr.msk.f32.vlgmr.msra.gmra.mxu1 %vm367_vm4, %v352_v14  ;;  %3708 = vmatprep.subr.msk.mxu0 %vm371_vm2, %v679_v15 }
  0xaf   : > { %3868 = vmatpush3.msk.msra.mxu1 %vm371_vm2, %v676_v13  ;;  %592 = vmatprep.mubr.f32.mxu0 %v4149_v3  ;;  %v838_v17 = vpop.permute.xlu0 %837 }
  0xb0   : > { %3704 = vmatmul.mubr.msk.f32.vlgmr.msra.gmra.mxu0 %vm367_vm4, %v352_v14  ;;  %v843_v20 = vsel %vm841_vm6, %v838_v17, %v840_v16  ;;  %3869 = vmatprep.mubr.msk.f32.mxu1 %vm4150_vm1, %v4149_v3 }
  0xb1   : > { %3709 = vmatpush1.msk.msra.mxu0 %vm371_vm2, %v678_v19  ;;  %3872 = vmatprep.subr.mxu1 %v4149_v3  ;;  %v1002_v21 = vpop.permute.xlu1 %1001 }
  0xb2   : > { %3870 = vmatmul.mubr.msk.f32.vlgmr.msra.gmra.mxu1 %vm367_vm4, %v3707_v18  ;;  %3714 = vmatprep.subr.msk.mxu0 %vm371_vm2, %v843_v20  ;;  %v1819_v20 = vlaneseq }
  0xb3   : > { %3873 = vmatpush3.msk.msra.mxu1 %vm371_vm2, %v840_v16  ;;  %753 = vmatprep.mubr.f32.mxu0 %v4149_v3  ;;  %v836_v22 = vpop.permute.xlu0 %835 }
  0xb4   : > { %3710 = vmatmul.mubr.msk.f32.vlgmr.msra.gmra.mxu0 %vm367_vm4, %v3707_v18  ;;  %v842_v24 = vsel %vm841_vm6, %v836_v22, %v838_v17  ;;  %3874 = vmatprep.mubr.msk.f32.mxu1 %vm4150_vm1, %v4149_v3 }
  0xb5   : > { %v1000_v25 = vpop.permute.xlu1 %999  ;;  %3715 = vmatpush1.msk.msra.mxu0 %vm371_vm2, %v842_v24  ;;  %917 = vmatprep.mubr.f32.mxu0 %v4149_v3 }
  0xb6   : > { %v1871_v26 = vrot.slane %v1000_v25, 4  ;;  %3877 = vmatprep.subr.mxu1 %v4149_v3  ;;  %3875 = vmatmul.mubr.msk.f32.vlgmr.msra.gmra.mxu1 %vm367_vm4, %v3713_v23  ;;  %v1006_v31 = vsel %vm1005_vm8, %v1000_v25, %v1002_v21 }
  0xb7   : > { %v1004_v27 = vpop.permute.xlu0 %1003  ;;  %3879 = vmatprep.mubr.msk.f32.mxu1 %vm4150_vm1, %v4149_v3 }
  0xb8   : > { %3716 = vmatmul.mubr.msk.f32.vlgmr.msra.gmra.mxu0 %vm367_vm4, %v3713_v23  ;;  %v1872_v28 = vrot.slane %v1004_v27, 4  ;;  %1880 = vst.msk [vmem:[%s1878_s13 + $0x8] sm:$0xf] %vm1845_vm7, %v1004_v27  ;;  %3878 = vmatpush3.msk.msra.mxu1 %vm371_vm2, %v1004_v27  ;;  %v1007_v29 = vsel %vm1005_vm8, %v1002_v21, %v1004_v27  ;;  %v1820_v27 = vshrl.u32 %v1819_v20, 7 }
  0xb9   : > { %v1168_v32 = vpop.permute.xlu1 %1167  ;;  %3720 = vmatprep.subr.msk.mxu0 %vm371_vm2, %v1007_v29  ;;  %1081 = vmatprep.mubr.f32.mxu0 %v4149_v3 }
  0xba   : > { %v1873_v33 = vsel %vm371_vm2, %v1871_v26, %v1872_v28  ;;  %3721 = vmatpush1.msk.msra.mxu0 %vm371_vm2, %v1006_v31  ;;  %3882 = vmatprep.subr.mxu1 %v4149_v3 }
  0xbb   : > { %v1874_v34 = vsel %vm1005_vm8, %v1000_v25, %v1873_v33  ;;  %v1166_v35 = vpop.permute.xlu0 %1165  ;;  %3880 = vmatmul.mubr.msk.f32.vlgmr.msra.gmra.mxu1 %vm367_vm4, %v3719_v30 }
  0xbc   : > { %1879 = vst [vmem:[%s1878_s13] sm:$0xff] %v1874_v34  ;;  %3722 = vmatmul.mubr.msk.f32.vlgmr.msra.gmra.mxu0 %vm367_vm4, %v3719_v30  ;;  %v1171_v36 = vsel %vm1169_vm9, %v1166_v35, %v1168_v32  ;;  %3883 = vmatpush3.msk.msra.mxu1 %vm371_vm2, %v1168_v32  ;;  %v1829_v34 = vsub.s32 2, %v1820_v27 }
  0xbd   : > { %v1330_v38 = vpop.permute.xlu1 %1329  ;;  %3726 = vmatprep.subr.msk.mxu0 %vm371_vm2, %v1171_v36  ;;  %3884 = vmatprep.mubr.msk.f32.mxu1 %vm4150_vm1, %v4149_v3 }
  0xbe   : > { %1245 = vmatprep.mubr.f32.mxu0 %v4149_v3  ;;  %3887 = vmatprep.subr.mxu1 %v4149_v3 }
  0xbf   : > { %v1164_v39 = vpop.permute.xlu0 %1163  ;;  %3885 = vmatmul.mubr.msk.f32.vlgmr.msra.gmra.mxu1 %vm367_vm4, %v3725_v37 }
  0xc0   : > { %v1170_v40 = vsel %vm1169_vm9, %v1164_v39, %v1166_v35  ;;  %3889 = vmatprep.mubr.msk.f32.mxu1 %vm4150_vm1, %v4149_v3  ;;  %v1817_v39 = vld [vmem:[%s4656_s7] sm:$0x7] }
  0xc1   : > { %v1328_v41 = vpop.permute.xlu1 %1327  ;;  %3727 = vmatpush1.msk.msra.mxu0 %vm371_vm2, %v1170_v40 }
  0xc2   : > { %3728 = vmatmul.mubr.msk.f32.vlgmr.msra.gmra.mxu0 %vm367_vm4, %v3725_v37  ;;  %v1334_v45 = vsel %vm1333_vm10, %v1328_v41, %v1330_v38 }
  0xc3   : > { %v1332_v43 = vpop.permute.xlu0 %1331  ;;  %1409 = vmatprep.mubr.f32.mxu0 %v4149_v3 }
  0xc4   : > { %v1335_v44 = vsel %vm1333_vm10, %v1330_v38, %v1332_v43  ;;  %3888 = vmatpush3.msk.msra.mxu1 %vm371_vm2, %v1332_v43 }
  0xc5   : > { %v1496_v46 = vpop.permute.xlu1 %1495  ;;  %3732 = vmatprep.subr.msk.mxu0 %vm371_vm2, %v1335_v44  ;;  %3890 = vmatmul.mubr.msk.f32.vlgmr.msra.gmra.mxu1 %vm367_vm4, %v3731_v42  ;;  %v1821_v44 = vsub.s32 0, %v1820_v27 }
  0xc6   : > { %3733 = vmatpush1.msk.msra.mxu0 %vm371_vm2, %v1334_v45  ;;  %3892 = vmatprep.subr.mxu1 %v4149_v3  ;;  %v1830_v45 = vrot.slane %v1817_v39, %v1829_v34 }
  0xc7   : > { %3734 = vmatmul.mubr.msk.f32.vlgmr.msra.gmra.mxu0 %vm367_vm4, %v3731_v42  ;;  %v1494_v48 = vpop.permute.xlu0 %1493  ;;  %3893 = vmatpush3.msk.msra.mxu1 %vm371_vm2, %v1496_v46 }
  0xc8   : > { %v1499_v49 = vsel %vm1497_vm11, %v1494_v48, %v1496_v46  ;;  %3894 = vmatprep.mubr.msk.f32.mxu1 %vm4150_vm1, %v4149_v3  ;;  %1573 = vmatprep.mubr.f32.mxu0 %v4149_v3 }
  0xc9   : > { %v1658_v50 = vpop.permute.xlu1 %1657  ;;  %3738 = vmatprep.subr.msk.mxu0 %vm371_vm2, %v1499_v49  ;;  %3895 = vmatmul.mubr.msk.f32.vlgmr.msra.gmra.mxu1 %vm367_vm4, %v3737_v47 }
  0xca   : > { %3897 = vmatprep.subr.mxu1 %v4149_v3  ;;  %3899 = vmatprep.mubr.msk.f32.mxu1 %vm4150_vm1, %v4149_v3 }
  0xcb   : > { %v1492_v51 = vpop.permute.xlu0 %1491 }
  0xcc   : > { %v1498_v52 = vsel %vm1497_vm11, %v1492_v51, %v1494_v48 }
  0xcd   : > { %3739 = vmatpush1.msk.msra.mxu0 %vm371_vm2, %v1498_v52  ;;  %v1656_v53 = vpop.permute.xlu1 %1655 }
  0xce   : > { %3740 = vmatmul.mubr.msk.f32.vlgmr.msra.gmra.mxu0 %vm367_vm4, %v3737_v47  ;;  %v1662_v57 = vsel %vm1661_vm12, %v1656_v53, %v1658_v50 }
  0xcf   : > { %v1660_v55 = vpop.permute.xlu0 %1659  ;;  %1737 = vmatprep.mubr.f32.mxu0 %v4149_v3 }
  0xd0   : > { %v1663_v56 = vsel %vm1661_vm12, %v1658_v50, %v1660_v55  ;;  %3898 = vmatpush3.msk.msra.mxu1 %vm371_vm2, %v1660_v55  ;;  %v1825_v50 = vsub.s32 1, %v1820_v27  ;;  %v1822_v55 = vrot.slane %v1817_v39, %v1821_v44 }
  0xd1   : > { %3744 = vmatprep.subr.msk.mxu0 %vm371_vm2, %v1663_v56  ;;  %3900 = vmatmul.mubr.msk.f32.vlgmr.msra.gmra.mxu1 %vm367_vm4, %v3743_v54 }
  0xd2   : > { %3745 = vmatpush1.msk.msra.mxu0 %vm371_vm2, %v1662_v57 }
  0xd3   : > { %3746 = vmatmul.mubr.msk.f32.vlgmr.msra.gmra.mxu0 %vm367_vm4, %v3743_v54 }
 0x169   : > { %v515_v58 = vpop.f32.mrf.mxu1 }
 0x16b   : > { %v444_v59 = vpop.f32.mrf.mxu0  ;;  %v3861_v60 = vpop.f32.mrf.mxu1 }
 0x16d   : > { %v446_v61 = vpop.f32.mrf.mxu0 }
 0x16e   : > { %v665_v62 = vpop.f32.mrf.mxu1 }
 0x16f   : > { %v666_v11 = vadd.f32 %v665_v62, %v515_v58 }
 0x170   : > { %v594_v63 = vpop.f32.mrf.mxu0  ;;  %v3866_v0 = vpop.f32.mrf.mxu1 }
 0x171   : > { %v595_v18 = vadd.f32 %v594_v63, %v444_v59 }
 0x172   : > { %v596_v1 = vpop.f32.mrf.mxu0  ;;  %v826_v2 = vpop.f32.mrf.mxu1 }
 0x173   : > { %v832_v15 = vadd.f32 %v826_v2, %v666_v11  ;;  %v597_v24 = vadd.f32 %v596_v1, %v446_v61  ;;  %v1826_v61 = vrot.slane %v1817_v39, %v1825_v50 }
 0x174   : > { %v755_v3 = vpop.f32.mrf.mxu0  ;;  %v3871_v4 = vpop.f32.mrf.mxu1 }
 0x175   : > { %v830_v25 = vadd.f32 %v755_v3, %v595_v18  ;;  %v1858_v18 = vld [vmem:[#allocation5] sm:$0xf] }
 0x176   : > { %v757_v5 = vpop.f32.mrf.mxu0  ;;  %v990_v6 = vpop.f32.mrf.mxu1 }
 0x177   : > { %v996_v21 = vadd.f32 %v990_v6, %v832_v15  ;;  %v831_v31 = vadd.f32 %v757_v5, %v597_v24 }
 0x178   : > { %v919_v7 = vpop.f32.mrf.mxu0  ;;  %v3876_v8 = vpop.f32.mrf.mxu1 }
 0x179   : > { %v994_v32 = vadd.f32 %v919_v7, %v830_v25 }
 0x17a   : > { %v921_v9 = vpop.f32.mrf.mxu0 }
 0x17b   : > { %v1154_v10 = vpop.f32.mrf.mxu1  ;;  %v995_v35 = vadd.f32 %v921_v9, %v831_v31 }
 0x17c   : > { %v1083_v12 = vpop.f32.mrf.mxu0  ;;  %v1160_v28 = vadd.f32 %v1154_v10, %v996_v21 }
 0x17d   : > { %v3881_v13 = vpop.f32.mrf.mxu1  ;;  %v1158_v36 = vadd.f32 %v1083_v12, %v994_v32 }
 0x17e   : > { %v1085_v16 = vpop.f32.mrf.mxu0 }
 0x17f   : > { %v1318_v14 = vpop.f32.mrf.mxu1  ;;  %v1159_v40 = vadd.f32 %v1085_v16, %v995_v35  ;;  %v1847_v16 = vld [vmem:[#allocation4] sm:$0xf] }
 0x180   : > { %v1324_v37 = vadd.f32 %v1318_v14, %v1160_v28 }
 0x181   : > { %v3886_v17 = vpop.f32.mrf.mxu1 }
 0x182   : > { %v1247_v19 = vpop.f32.mrf.mxu0 }
 0x183   : > { %v1322_v41 = vadd.f32 %v1247_v19, %v1158_v36 }
 0x184   : > { %v1249_v22 = vpop.f32.mrf.mxu0 }
 0x185   : > { %v1482_v23 = vpop.f32.mrf.mxu1  ;;  %v1323_v46 = vadd.f32 %v1249_v22, %v1159_v40 }
 0x186   : > { %v1488_v42 = vadd.f32 %v1482_v23, %v1324_v37 }
 0x187   : > { %v3891_v26 = vpop.f32.mrf.mxu1  ;;  %v1411_v29 = vpop.f32.mrf.mxu0 }
 0x188   : > { %v1486_v47 = vadd.f32 %v1411_v29, %v1322_v41 }
 0x189   : > { %v1646_v30 = vpop.f32.mrf.mxu1  ;;  %v1413_v38 = vpop.f32.mrf.mxu0 }
 0x18a   : > { %v1652_v48 = vadd.f32 %v1646_v30, %v1488_v42  ;;  %v1487_v52 = vadd.f32 %v1413_v38, %v1323_v46 }
 0x18b   : > { %v3896_v33 = vpop.f32.mrf.mxu1 }
 0x18e   : > { %v1575_v43 = vpop.f32.mrf.mxu0 }
 0x18f   : > { %v1650_v53 = vadd.f32 %v1575_v43, %v1486_v47 }
 0x190   : > { %v1577_v49 = vpop.f32.mrf.mxu0 }
 0x191   : > { %v1810_v51 = vpop.f32.mrf.mxu1  ;;  %v1651_v58 = vadd.f32 %v1577_v49, %v1487_v52 }
 0x192   : > { %v1816_v54 = vadd.f32 %v1810_v51, %v1652_v48 }
 0x193   : > { %v1739_v56 = vpop.f32.mrf.mxu0  ;;  %v3901_v57 = vpop.f32.mrf.mxu1 }
 0x194   : > { %v1836_v59 = vmul.f32 %v1830_v45, %v1816_v54  ;;  %v1814_v60 = vadd.f32 %v1739_v56, %v1650_v53 }
 0x195   : > { %v1741_v62 = vpop.f32.mrf.mxu0 }
 0x196   : > { %1846 = vst.msk [vmem:[%s1843_s16 + $0x8] sm:$0xf] %vm1845_vm7, %v1836_v59  ;;  %v1834_v63 = vmul.f32 %v1822_v55, %v1814_v60  ;;  %v1815_v0 = vadd.f32 %v1741_v62, %v1651_v58  ;;  %v1861_v3 = vmul.f32 %v1836_v59, %v1836_v59  ;;  %v1851_v9 = vsel %vm1845_vm7, %v1836_v59, 0.0 }
 0x198   : > { %v1835_v1 = vmul.f32 %v1826_v61, %v1815_v0  ;;  %v1859_v2 = vmul.f32 %v1834_v63, %v1834_v63  ;;  %v1848_v5 = vsel %vm371_vm2, %v1834_v63, 0.0  ;;  %v1865_v14 = vsel %vm1845_vm7, %v1861_v3, 0.0 }
 0x19a   : > { %v1839_v4 = vcombine.low %v1834_v63, %v1835_v1  ;;  %v1849_v6 = vsel %vm371_vm2, %v1835_v1, 0.0  ;;  %v1860_v7 = vmul.f32 %v1835_v1, %v1835_v1  ;;  %v1862_v10 = vsel %vm371_vm2, %v1859_v2, 0.0 }
 0x19b   : > { %v1850_v8 = vadd.f32 %v1849_v6, %v1848_v5 }
 0x19c   : > { %1844 = vst [vmem:[%s1843_s16] sm:$0xff] %v1839_v4  ;;  %v1863_v11 = vsel %vm371_vm2, %v1860_v7, 0.0 }
 0x19d   : > { %v1852_v12 = vadd.f32 %v1851_v9, %v1850_v8  ;;  %v1864_v13 = vadd.f32 %v1863_v11, %v1862_v10 }
 0x19f   : > { %1853 = vadd.xlane.f32.xlu0 %v1852_v12  ;;  %v1866_v15 = vadd.f32 %v1865_v14, %v1864_v13 }
 0x1a1   : > { %1867 = vadd.xlane.f32.xlu1 %v1866_v15 }
 0x228   : > { %v1854_v17 = vpop.xlane.xlu0 %1853 }
 0x229   : > { %v1855_v19 = vadd.f32 %v1854_v17, %v1847_v16 }
 0x22a   : > { %v1868_v20 = vpop.xlane.xlu1 %1867 }
 0x22b   : > { %1857 = vst.msk [vmem:[#allocation4] sm:$0xf] %vm1856_vm13, %v1855_v19  ;;  %v1869_v21 = vadd.f32 %v1868_v20, %v1858_v18 }
 0x22d   : > { %1870 = vst.msk [vmem:[#allocation5] sm:$0xf] %vm1856_vm13, %v1869_v21 }
 0x22e PF: > { %p3751_p5 = scmp.ne.s32.totalorder %s4133_s9, 1 }
 0x22f   : > { %p3752_p6 = scmp.ne.s32.totalorder (!%p3751_p5), %s4129_s30, 0 }
 0x230   : > { %1884 = sbr.rel (%p3751_p5) target bundleno = 1364 (0x554), region = 64 }
 0x235   : > { %1887 = sbr.rel (%p3752_p6) target bundleno = 728 (0x2d8), region = 68  ;;  %s4666_s2 = sld [smem:[#allocation16_spill]] (!%p3752_p6) }
 0x23a   : > { %v1888_v22 = vld [vmem:[#allocation4] sm:$0xf]  ;;  %v1890_v23 = vld [vmem:[#allocation5] sm:$0xf]  ;;  %v4158_v24 = vmov 0   ;;  %v1908_v36 = vlaneseq  ;;  %vm1931_vm14 = vcmask 257024  }
 0x23b   : > { %4047 = vset.pattern.permute.xlu0 %v4158_v24  ;;  %v1889_v25 = vmul.f32 0.001953125, %v1888_v22  ;;  %v1891_v26 = vmul.f32 0.001953125, %v1890_v23  ;;  %v1894_v30 = vld [vmem:[%s4666_s2] sm:$0xf] }
 0x23c   : > { %v1898_v33 = vld [vmem:[%s4652_s3] sm:$0xf]  ;;  %v1909_v37 = vshrl.u32 %v1908_v36, 7 }
 0x23d   : > { %v1892_v27 = vmul.f32 %v1889_v25, %v1889_v25  ;;  %v1901_v41 = vld [vmem:[%s4656_s7] sm:$0x7] }
 0x23e   : > { %v1910_v38 = vsub.s32 0, %v1909_v37  ;;  %v1914_v39 = vsub.s32 1, %v1909_v37  ;;  %v1918_v40 = vsub.s32 2, %v1909_v37  ;;  %v1933_v45 = vld [vmem:[%s4656_s7] sm:$0x7] }
 0x23f   : > { %v1893_v28 = vsub.f32 %v1891_v26, %v1892_v27 }
 0x240   : > { %v1911_v42 = vrot.slane %v1901_v41, %v1910_v38  ;;  %v1915_v43 = vrot.slane %v1901_v41, %v1914_v39  ;;  %v1919_v44 = vrot.slane %v1901_v41, %v1918_v40  ;;  %v1943_v47 = vrot.slane %v1933_v45, %v1910_v38 }
 0x241   : > { %v1895_v29 = vadd.f32 1e-05, %v1893_v28  ;;  %v1947_v48 = vrot.slane %v1933_v45, %v1914_v39  ;;  %v1951_v52 = vrot.slane %v1933_v45, %v1918_v40 }
 0x243   : > { %4048 = vrsqrt.f32 %v1895_v29 }
 0x250   : > { %v4049_v31 = vpop.eup %4048 }
 0x251   : > { %v1897_v32 = vmul.f32 %v4049_v31, %v1894_v30 }
 0x253   : > { %1904 = vperm.xlu0 %4047, %v1897_v32   ;;  %v1899_v34 = vmul.f32 %v1897_v32, %v1889_v25 }
 0x255   : > { %v1900_v35 = vsub.f32 %v1898_v33, %v1899_v34 }
 0x257   : > { %1936 = vperm.xlu0 %4047, %v1900_v35  }
 0x2ce   : > { %v1905_v46 = vpop.permute.xlu0 %1904 }
 0x2cf   : > { %v1923_v49 = vmul.f32 %v1911_v42, %v1905_v46  ;;  %v1924_v50 = vmul.f32 %v1915_v43, %v1905_v46  ;;  %v1925_v51 = vmul.f32 %v1919_v44, %v1905_v46 }
 0x2d1   : > { %v1928_v53 = vcombine.low %v1923_v49, %v1924_v50  ;;  %1932 = vst.msk [vmem:[#allocation8 + $0x8] sm:$0xf] %vm1931_vm14, %v1925_v51 }
 0x2d2   : > { %v1937_v54 = vpop.permute.xlu0 %1936 }
 0x2d3   : > { %1930 = vst [vmem:[#allocation8] sm:$0xff] %v1928_v53  ;;  %v1955_v55 = vmul.f32 %v1943_v47, %v1937_v54  ;;  %v1956_v56 = vmul.f32 %v1947_v48, %v1937_v54  ;;  %v1957_v57 = vmul.f32 %v1951_v52, %v1937_v54 }
 0x2d5   : > { %v1960_v58 = vcombine.low %v1955_v55, %v1956_v56  ;;  %1964 = vst.msk [vmem:[#allocation8 + $0x14] sm:$0xf] %vm1931_vm14, %v1957_v57 }
 0x2d7   : > { %1963 = vst [vmem:[#allocation8 + $0xc] sm:$0xff] %v1960_v58 }
 0x2d8 PF: > { %s3817_s17 = smul.u32 12, %s4129_s30  ;;  %v1971_v60 = vld [vmem:[#allocation8 + $0x8] sm:$0xf]  ;;  %s4159_s25 = smov 19   ;;  %v4160_v8 = vmov 0.0   ;;  %vm1990_vm15 = vcmask 154624  }
 0x2d9   : > { %3902 = vmatprep.subr.mxu1 %v4160_v8  ;;  %2087 = vmatprep.mubr.f32.mxu0 %v4160_v8  ;;  %vm4161_vm0 = vmmov 0   ;;  %s4162_s26 = smov 127   ;;  %s4163_s13 = smov 126   ;;  %vm1996_vm1 = vcmask 416768   ;;  %vm2016_vm2 = vcmask 1043456   ;;  %vm2009_vm3 = vcmask 1039360  }
 0x2da   : > { %v1970_v59 = vld [vmem:[#allocation8] sm:$0xff]  ;;  %s1967_s20 = scalar_lea.vmem [#allocation2], %s3817_s17  ;;  %3904 = vmatprep.mubr.msk.f32.mxu1 %vm4161_vm0, %v4160_v8  ;;  %s4164_s16 = smov 110   ;;  %vm2012_vm4 = vcmask 31744   ;;  %vm2322_vm5 = vcmask 1031168   ;;  %vm2486_vm6 = vcmask 900096  }
 0x2db   : > { %v1968_v61 = vld [vmem:[%s1967_s20] sm:$0xff]  ;;  %v1969_v62 = vld [vmem:[%s1967_s20 + $0x8] sm:$0xf]  ;;  %s4165_s22 = smov 109   ;;  %s4166_s20 = smov 108   ;;  %vm2650_vm7 = vcmask 891904  }
 0x2dc   : > { %v1972_v0 = vmul.f32 %v1970_v59, %v1968_v61  ;;  %v1973_v1 = vmul.f32 %v1971_v60, %v1969_v62  ;;  %v1976_v2 = vld [vmem:[#allocation8 + $0x14] sm:$0xf]  ;;  %s4168_s24 = smov 91   ;;  %v3754_v22 = vld [vmem:[%s4653_s4 + $0x4] sm:$0xf]  ;;  %vm2814_vm8 = vcmask 883712  }
 0x2dd   : > { %v1998_v27 = vld [vmem:[%s4653_s4] sm:$0xf]  ;;  %v3765_v30 = vld [vmem:[%s4653_s4 + $0x8] sm:$0xf]  ;;  %v3771_v35 = vld [vmem:[%s4653_s4 + $0xc] sm:$0xf] }
 0x2de   : > { %v1975_v63 = vld [vmem:[#allocation8 + $0xc] sm:$0xff]  ;;  %v1978_v5 = vadd.f32 %v1976_v2, %v1973_v1  ;;  %v3783_v45 = vld [vmem:[%s4653_s4 + $0x14] sm:$0xf]  ;;  %vm2978_vm9 = vcmask 752640   ;;  %v3789_v50 = vld [vmem:[%s4653_s4 + $0x18] sm:$0xf] }
 0x2df   : > { %v1977_v3 = vadd.f32 %v1975_v63, %v1972_v0  ;;  %v3777_v40 = vld [vmem:[%s4653_s4 + $0x10] sm:$0xf]  ;;  %vm3142_vm10 = vcmask 744448   ;;  %v3795_v55 = vld [vmem:[%s4653_s4 + $0x1c] sm:$0xf]  ;;  %vm3306_vm11 = vcmask 736256  }
 0x2e0   : > { %v1980_v7 = vmax.f32 %v1978_v5, 0.0  ;;  %v3801_v60 = vld [vmem:[%s4653_s4 + $0x20] sm:$0xf]  ;;  %vm3489_vm12 = vcmask 257024   ;;  %vm3500_vm13 = vcmask 3072  }
 0x2e1   : > { %v1979_v4 = vmax.f32 %v1977_v3, 0.0 }
 0x2e3   : > { %1984 = vrot.lane.b32.xlu1 %v1979_v4, %s4159_s25  ;;  %v1983_v6 = vcombine.high %v1979_v4, %v1979_v4 }
 0x2e5   : > { %1986 = vrot.lane.b32.xlu0 %v1983_v6, %s4159_s25 }
 0x2e9   : > { %1988 = vrot.lane.b32.xlu0 %v1980_v7, %s4159_s25  ;;  %s4167_s25 = smov 92  }
 0x355   : > { %v1985_v9 = vpop.permute.xlu1 %1984 }
 0x356   : > { %v1995_v10 = vsel %vm1990_vm15, 0.0, %v1985_v9 }
 0x357   : > { %2003 = vrot.lane.b32.xlu1 %v1995_v10, %s4162_s26  ;;  %2316 = vrot.lane.b32.xlu0 %v1995_v10, %s4163_s13  ;;  %v1987_v11 = vpop.permute.xlu0 %1986 }
 0x358   : > { %v1991_v12 = vsel %vm1990_vm15, %v1985_v9, %v1987_v11 }
 0x35b   : > { %2480 = vrot.lane.b32.xlu1 %v1995_v10, %s4164_s16  ;;  %2318 = vrot.lane.b32.xlu0 %v1991_v12, %s4163_s13  ;;  %v1989_v13 = vpop.permute.xlu0 %1988 }
 0x35c   : > { %v1992_v14 = vsel %vm1990_vm15, %v1987_v11, %v1989_v13 }
 0x35d   : > { %v1997_v15 = vsel %vm1996_vm1, %v1992_v14, 0.0 }
 0x35f   : > { %2005 = vrot.lane.b32.xlu1 %v1991_v12, %s4162_s26  ;;  %2007 = vrot.lane.b32.xlu0 %v1997_v15, %s4162_s26  ;;  %s4169_s26 = smov 90  }
 0x363   : > { %2482 = vrot.lane.b32.xlu1 %v1991_v12, %s4164_s16  ;;  %2646 = vrot.lane.b32.xlu0 %v1991_v12, %s4165_s22 }
 0x367   : > { %2810 = vrot.lane.b32.xlu1 %v1991_v12, %s4166_s20  ;;  %2644 = vrot.lane.b32.xlu0 %v1995_v10, %s4165_s22 }
 0x36b   : > { %2320 = vrot.lane.b32.xlu1 %v1997_v15, %s4163_s13  ;;  %2484 = vrot.lane.b32.xlu0 %v1997_v15, %s4164_s16 }
 0x36f   : > { %2808 = vrot.lane.b32.xlu1 %v1995_v10, %s4166_s20  ;;  %2974 = vrot.lane.b32.xlu0 %v1991_v12, %s4167_s25 }
 0x373   : > { %2648 = vrot.lane.b32.xlu1 %v1997_v15, %s4165_s22  ;;  %2812 = vrot.lane.b32.xlu0 %v1997_v15, %s4166_s20 }
 0x377   : > { %3138 = vrot.lane.b32.xlu1 %v1991_v12, %s4168_s24  ;;  %2972 = vrot.lane.b32.xlu0 %v1995_v10, %s4167_s25 }
 0x37b   : > { %2976 = vrot.lane.b32.xlu1 %v1997_v15, %s4167_s25  ;;  %3140 = vrot.lane.b32.xlu0 %v1997_v15, %s4168_s24 }
 0x37f   : > { %3136 = vrot.lane.b32.xlu1 %v1995_v10, %s4168_s24  ;;  %3302 = vrot.lane.b32.xlu0 %v1991_v12, %s4169_s26 }
 0x383   : > { %3304 = vrot.lane.b32.xlu1 %v1997_v15, %s4169_s26  ;;  %3300 = vrot.lane.b32.xlu0 %v1995_v10, %s4169_s26  ;;  %s3487_s26 = scalar_lea.vmem [#allocation3], %s3817_s17 }
 0x3c9   : > { %v2004_v16 = vpop.permute.xlu1 %2003  ;;  %v2317_v17 = vpop.permute.xlu0 %2316 }
 0x3cd   : > { %v2481_v18 = vpop.permute.xlu1 %2480  ;;  %v2319_v19 = vpop.permute.xlu0 %2318 }
 0x3ce   : > { %v2323_v34 = vsel %vm2322_vm5, %v2317_v17, %v2319_v19 }
 0x3d1   : > { %v2006_v20 = vpop.permute.xlu1 %2005  ;;  %v2008_v21 = vpop.permute.xlu0 %2007 }
 0x3d2   : > { %3903 = vmatpush3.msk.msra.mxu1 %vm2016_vm2, %v2008_v21  ;;  %v2011_v23 = vsel %vm2009_vm3, %v2006_v20, %v2008_v21  ;;  %v2010_v24 = vsel %vm2009_vm3, %v2004_v16, %v2006_v20  ;;  %v3464_v21 = vlaneseq }
 0x3d3   : > { %3755 = vmatprep.subr.msk.mxu0 %vm2016_vm2, %v2011_v23  ;;  %3907 = vmatprep.subr.mxu1 %v4160_v8 }
 0x3d4   : > { %3756 = vmatpush1.msk.msra.mxu0 %vm2016_vm2, %v2010_v24  ;;  %3905 = vmatmul.mubr.msk.f32.vlgmr.msra.gmra.mxu1 %vm2012_vm4, %v3754_v22 }
 0x3d5   : > { %3908 = vmatpush3.msk.msra.mxu1 %vm2016_vm2, %v1997_v15  ;;  %v2483_v25 = vpop.permute.xlu1 %2482  ;;  %3760 = vmatprep.subr.msk.mxu0 %vm2016_vm2, %v1991_v12  ;;  %v2647_v26 = vpop.permute.xlu0 %2646 }
 0x3d6   : > { %3757 = vmatmul.mubr.msk.f32.vlgmr.msra.gmra.mxu0 %vm2012_vm4, %v3754_v22  ;;  %3909 = vmatprep.mubr.msk.f32.mxu1 %vm4161_vm0, %v4160_v8  ;;  %v2487_v39 = vsel %vm2486_vm6, %v2481_v18, %v2483_v25 }
 0x3d7   : > { %3761 = vmatpush1.msk.msra.mxu0 %vm2016_vm2, %v1995_v10  ;;  %2237 = vmatprep.mubr.f32.mxu0 %v4160_v8 }
 0x3d8   : > { %3910 = vmatmul.mubr.msk.f32.vlgmr.msra.gmra.mxu1 %vm2012_vm4, %v1998_v27  ;;  %3912 = vmatprep.subr.mxu1 %v4160_v8 }
 0x3d9   : > { %v2811_v28 = vpop.permute.xlu1 %2810  ;;  %v2645_v29 = vpop.permute.xlu0 %2644  ;;  %3914 = vmatprep.mubr.msk.f32.mxu1 %vm4161_vm0, %v4160_v8 }
 0x3da   : > { %3762 = vmatmul.mubr.msk.f32.vlgmr.msra.gmra.mxu0 %vm2012_vm4, %v1998_v27  ;;  %v2651_v44 = vsel %vm2650_vm7, %v2645_v29, %v2647_v26 }
 0x3db   : > { %2398 = vmatprep.mubr.f32.mxu0 %v4160_v8 }
 0x3dd   : > { %v2321_v31 = vpop.permute.xlu1 %2320  ;;  %v2485_v32 = vpop.permute.xlu0 %2484 }
 0x3de   : > { %v2324_v33 = vsel %vm2322_vm5, %v2319_v19, %v2321_v31  ;;  %3913 = vmatpush3.msk.msra.mxu1 %vm2016_vm2, %v2321_v31  ;;  %v2488_v36 = vsel %vm2486_vm6, %v2483_v25, %v2485_v32 }
 0x3df   : > { %3766 = vmatprep.subr.msk.mxu0 %vm2016_vm2, %v2324_v33  ;;  %3915 = vmatmul.mubr.msk.f32.vlgmr.msra.gmra.mxu1 %vm2012_vm4, %v3765_v30 }
 0x3e0   : > { %3917 = vmatprep.subr.mxu1 %v4160_v8  ;;  %3767 = vmatpush1.msk.msra.mxu0 %vm2016_vm2, %v2323_v34 }
 0x3e1   : > { %3918 = vmatpush3.msk.msra.mxu1 %vm2016_vm2, %v2485_v32  ;;  %v2809_v37 = vpop.permute.xlu1 %2808  ;;  %3768 = vmatmul.mubr.msk.f32.vlgmr.msra.gmra.mxu0 %vm2012_vm4, %v3765_v30  ;;  %v2975_v38 = vpop.permute.xlu0 %2974 }
 0x3e2   : > { %3772 = vmatprep.subr.msk.mxu0 %vm2016_vm2, %v2488_v36  ;;  %3919 = vmatprep.mubr.msk.f32.mxu1 %vm4161_vm0, %v4160_v8  ;;  %v2815_v49 = vsel %vm2814_vm8, %v2809_v37, %v2811_v28 }
 0x3e3   : > { %3773 = vmatpush1.msk.msra.mxu0 %vm2016_vm2, %v2487_v39  ;;  %3920 = vmatmul.mubr.msk.f32.vlgmr.msra.gmra.mxu1 %vm2012_vm4, %v3771_v35 }
 0x3e4   : > { %2562 = vmatprep.mubr.f32.mxu0 %v4160_v8  ;;  %3922 = vmatprep.subr.mxu1 %v4160_v8 }
 0x3e5   : > { %v2649_v41 = vpop.permute.xlu1 %2648  ;;  %3774 = vmatmul.mubr.msk.f32.vlgmr.msra.gmra.mxu0 %vm2012_vm4, %v3771_v35  ;;  %v2813_v42 = vpop.permute.xlu0 %2812  ;;  %3924 = vmatprep.mubr.msk.f32.mxu1 %vm4161_vm0, %v4160_v8 }
 0x3e6   : > { %v2652_v43 = vsel %vm2650_vm7, %v2647_v26, %v2649_v41  ;;  %3923 = vmatpush3.msk.msra.mxu1 %vm2016_vm2, %v2649_v41  ;;  %2726 = vmatprep.mubr.f32.mxu0 %v4160_v8  ;;  %v2816_v46 = vsel %vm2814_vm8, %v2811_v28, %v2813_v42  ;;  %v3465_v28 = vshrl.u32 %v3464_v21, 7 }
 0x3e7   : > { %3778 = vmatprep.subr.msk.mxu0 %vm2016_vm2, %v2652_v43  ;;  %3925 = vmatmul.mubr.msk.f32.vlgmr.msra.gmra.mxu1 %vm2012_vm4, %v3777_v40  ;;  %v3462_v43 = vld [vmem:[%s4656_s7] sm:$0x7] }
 0x3e8   : > { %3927 = vmatprep.subr.mxu1 %v4160_v8  ;;  %3779 = vmatpush1.msk.msra.mxu0 %vm2016_vm2, %v2651_v44  ;;  %v3474_v39 = vsub.s32 2, %v3465_v28 }
 0x3e9   : > { %3928 = vmatpush3.msk.msra.mxu1 %vm2016_vm2, %v2813_v42  ;;  %v3139_v47 = vpop.permute.xlu1 %3138  ;;  %3780 = vmatmul.mubr.msk.f32.vlgmr.msra.gmra.mxu0 %vm2012_vm4, %v3777_v40  ;;  %v2973_v48 = vpop.permute.xlu0 %2972 }
 0x3ea   : > { %3784 = vmatprep.subr.msk.mxu0 %vm2016_vm2, %v2816_v46  ;;  %3929 = vmatprep.mubr.msk.f32.mxu1 %vm4161_vm0, %v4160_v8  ;;  %v2979_v54 = vsel %vm2978_vm9, %v2973_v48, %v2975_v38 }
 0x3eb   : > { %3785 = vmatpush1.msk.msra.mxu0 %vm2016_vm2, %v2815_v49  ;;  %3930 = vmatmul.mubr.msk.f32.vlgmr.msra.gmra.mxu1 %vm2012_vm4, %v3783_v45  ;;  %v3466_v49 = vsub.s32 0, %v3465_v28 }
 0x3ec   : > { %2890 = vmatprep.mubr.f32.mxu0 %v4160_v8  ;;  %3932 = vmatprep.subr.mxu1 %v4160_v8 }
 0x3ed   : > { %v2977_v51 = vpop.permute.xlu1 %2976  ;;  %3786 = vmatmul.mubr.msk.f32.vlgmr.msra.gmra.mxu0 %vm2012_vm4, %v3783_v45  ;;  %v3141_v52 = vpop.permute.xlu0 %3140  ;;  %3934 = vmatprep.mubr.msk.f32.mxu1 %vm4161_vm0, %v4160_v8 }
 0x3ee   : > { %v2980_v53 = vsel %vm2978_vm9, %v2975_v38, %v2977_v51  ;;  %3933 = vmatpush3.msk.msra.mxu1 %vm2016_vm2, %v2977_v51  ;;  %3054 = vmatprep.mubr.f32.mxu0 %v4160_v8  ;;  %v3144_v56 = vsel %vm3142_vm10, %v3139_v47, %v3141_v52 }
 0x3ef   : > { %3790 = vmatprep.subr.msk.mxu0 %vm2016_vm2, %v2980_v53  ;;  %3935 = vmatmul.mubr.msk.f32.vlgmr.msra.gmra.mxu1 %vm2012_vm4, %v3789_v50 }
 0x3f0   : > { %3937 = vmatprep.subr.mxu1 %v4160_v8  ;;  %3791 = vmatpush1.msk.msra.mxu0 %vm2016_vm2, %v2979_v54 }
 0x3f1   : > { %3938 = vmatpush3.msk.msra.mxu1 %vm2016_vm2, %v3141_v52  ;;  %v3137_v57 = vpop.permute.xlu1 %3136  ;;  %3792 = vmatmul.mubr.msk.f32.vlgmr.msra.gmra.mxu0 %vm2012_vm4, %v3789_v50  ;;  %v3303_v58 = vpop.permute.xlu0 %3302  ;;  %v3475_v52 = vrot.slane %v3462_v43, %v3474_v39 }
 0x3f2   : > { %v3143_v59 = vsel %vm3142_vm10, %v3137_v57, %v3139_v47  ;;  %3796 = vmatprep.subr.msk.mxu0 %vm2016_vm2, %v3144_v56  ;;  %3939 = vmatprep.mubr.msk.f32.mxu1 %vm4161_vm0, %v4160_v8  ;;  %v3470_v56 = vsub.s32 1, %v3465_v28 }
 0x3f3   : > { %3797 = vmatpush1.msk.msra.mxu0 %vm2016_vm2, %v3143_v59  ;;  %3940 = vmatmul.mubr.msk.f32.vlgmr.msra.gmra.mxu1 %vm2012_vm4, %v3795_v55 }
 0x3f4   : > { %3218 = vmatprep.mubr.f32.mxu0 %v4160_v8  ;;  %3942 = vmatprep.subr.mxu1 %v4160_v8 }
 0x3f5   : > { %v3305_v61 = vpop.permute.xlu1 %3304  ;;  %3798 = vmatmul.mubr.msk.f32.vlgmr.msra.gmra.mxu0 %vm2012_vm4, %v3795_v55  ;;  %v3301_v62 = vpop.permute.xlu0 %3300  ;;  %3944 = vmatprep.mubr.msk.f32.mxu1 %vm4161_vm0, %v4160_v8 }
 0x3f6   : > { %v3308_v63 = vsel %vm3306_vm11, %v3303_v58, %v3305_v61  ;;  %v3307_v0 = vsel %vm3306_vm11, %v3301_v62, %v3303_v58  ;;  %3943 = vmatpush3.msk.msra.mxu1 %vm2016_vm2, %v3305_v61  ;;  %3382 = vmatprep.mubr.f32.mxu0 %v4160_v8  ;;  %v3467_v62 = vrot.slane %v3462_v43, %v3466_v49 }
 0x3f7   : > { %3802 = vmatprep.subr.msk.mxu0 %vm2016_vm2, %v3308_v63  ;;  %3945 = vmatmul.mubr.msk.f32.vlgmr.msra.gmra.mxu1 %vm2012_vm4, %v3801_v60 }
 0x3f8   : > { %3803 = vmatpush1.msk.msra.mxu0 %vm2016_vm2, %v3307_v0 }
 0x3f9   : > { %3804 = vmatmul.mubr.msk.f32.vlgmr.msra.gmra.mxu0 %vm2012_vm4, %v3801_v60 }
 0x494   : > { %v2160_v1 = vpop.f32.mrf.mxu1 }
 0x496   : > { %v2089_v2 = vpop.f32.mrf.mxu0  ;;  %v3906_v3 = vpop.f32.mrf.mxu1 }
 0x498   : > { %v2091_v4 = vpop.f32.mrf.mxu0  ;;  %v2310_v5 = vpop.f32.mrf.mxu1 }
 0x499   : > { %v2311_v18 = vadd.f32 %v2310_v5, %v2160_v1 }
 0x49a   : > { %v3911_v6 = vpop.f32.mrf.mxu1  ;;  %v2239_v7 = vpop.f32.mrf.mxu0 }
 0x49b   : > { %v2240_v24 = vadd.f32 %v2239_v7, %v2089_v2 }
 0x49c   : > { %v2241_v9 = vpop.f32.mrf.mxu0 }
 0x49d   : > { %v2242_v29 = vadd.f32 %v2241_v9, %v2091_v4  ;;  %v3471_v4 = vrot.slane %v3462_v43, %v3470_v56 }
 0x49f   : > { %v2471_v10 = vpop.f32.mrf.mxu1 }
 0x4a0   : > { %v2477_v25 = vadd.f32 %v2471_v10, %v2311_v18 }
 0x4a1   : > { %v2400_v11 = vpop.f32.mrf.mxu0  ;;  %v3916_v12 = vpop.f32.mrf.mxu1 }
 0x4a2   : > { %v2475_v30 = vadd.f32 %v2400_v11, %v2240_v24 }
 0x4a3   : > { %v2402_v8 = vpop.f32.mrf.mxu0  ;;  %v2635_v13 = vpop.f32.mrf.mxu1 }
 0x4a4   : > { %v2641_v31 = vadd.f32 %v2635_v13, %v2477_v25  ;;  %v2476_v34 = vadd.f32 %v2402_v8, %v2242_v29  ;;  %v3502_v25 = vld [vmem:[#allocation7] sm:$0xf] }
 0x4a5   : > { %v2564_v14 = vpop.f32.mrf.mxu0  ;;  %v3921_v15 = vpop.f32.mrf.mxu1 }
 0x4a6   : > { %v2639_v35 = vadd.f32 %v2564_v14, %v2475_v30 }
 0x4a7   : > { %v2566_v16 = vpop.f32.mrf.mxu0  ;;  %v2799_v17 = vpop.f32.mrf.mxu1 }
 0x4a8   : > { %v2805_v36 = vadd.f32 %v2799_v17, %v2641_v31  ;;  %v2640_v40 = vadd.f32 %v2566_v16, %v2476_v34 }
 0x4a9   : > { %v2728_v19 = vpop.f32.mrf.mxu0  ;;  %v3926_v20 = vpop.f32.mrf.mxu1 }
 0x4aa   : > { %v2803_v41 = vadd.f32 %v2728_v19, %v2639_v35 }
 0x4ab   : > { %v2730_v22 = vpop.f32.mrf.mxu0  ;;  %v2963_v23 = vpop.f32.mrf.mxu1 }
 0x4ac   : > { %v2969_v42 = vadd.f32 %v2963_v23, %v2805_v36  ;;  %v2804_v46 = vadd.f32 %v2730_v22, %v2640_v40  ;;  %v3491_v23 = vld [vmem:[#allocation6] sm:$0xf] }
 0x4ad   : > { %v2892_v26 = vpop.f32.mrf.mxu0  ;;  %v3931_v27 = vpop.f32.mrf.mxu1 }
 0x4ae   : > { %v2967_v47 = vadd.f32 %v2892_v26, %v2803_v41 }
 0x4af   : > { %v2894_v32 = vpop.f32.mrf.mxu0  ;;  %v3127_v33 = vpop.f32.mrf.mxu1 }
 0x4b0   : > { %v3133_v48 = vadd.f32 %v3127_v33, %v2969_v42  ;;  %v2968_v53 = vadd.f32 %v2894_v32, %v2804_v46 }
 0x4b1   : > { %v3056_v37 = vpop.f32.mrf.mxu0  ;;  %v3936_v38 = vpop.f32.mrf.mxu1 }
 0x4b2   : > { %v3131_v54 = vadd.f32 %v3056_v37, %v2967_v47 }
 0x4b3   : > { %v3058_v44 = vpop.f32.mrf.mxu0  ;;  %v3291_v45 = vpop.f32.mrf.mxu1 }
 0x4b4   : > { %v3297_v55 = vadd.f32 %v3291_v45, %v3133_v48  ;;  %v3132_v59 = vadd.f32 %v3058_v44, %v2968_v53 }
 0x4b5   : > { %v3220_v50 = vpop.f32.mrf.mxu0  ;;  %v3941_v51 = vpop.f32.mrf.mxu1 }
 0x4b6   : > { %v3295_v60 = vadd.f32 %v3220_v50, %v3131_v54 }
 0x4b7   : > { %v3222_v57 = vpop.f32.mrf.mxu0  ;;  %v3455_v58 = vpop.f32.mrf.mxu1 }
 0x4b8   : > { %v3461_v61 = vadd.f32 %v3455_v58, %v3297_v55  ;;  %v3296_v1 = vadd.f32 %v3222_v57, %v3132_v59 }
 0x4b9   : > { %v3384_v63 = vpop.f32.mrf.mxu0  ;;  %v3946_v0 = vpop.f32.mrf.mxu1 }
 0x4ba   : > { %v3481_v2 = vmul.f32 %v3475_v52, %v3461_v61  ;;  %v3459_v3 = vadd.f32 %v3384_v63, %v3295_v60 }
 0x4bb   : > { %v3386_v5 = vpop.f32.mrf.mxu0 }
 0x4bc   : > { %v3479_v6 = vmul.f32 %v3467_v62, %v3459_v3  ;;  %v3460_v7 = vadd.f32 %v3386_v5, %v3296_v1  ;;  %3490 = vst.msk [vmem:[%s3487_s26 + $0x8] sm:$0xf] %vm3489_vm12, %v3481_v2  ;;  %v3505_v11 = vmul.f32 %v3481_v2, %v3481_v2  ;;  %v3495_v16 = vsel %vm3489_vm12, %v3481_v2, 0.0 }
 0x4be   : > { %v3480_v9 = vmul.f32 %v3471_v4, %v3460_v7  ;;  %v3503_v10 = vmul.f32 %v3479_v6, %v3479_v6  ;;  %v3492_v8 = vsel %vm2016_vm2, %v3479_v6, 0.0  ;;  %v3509_v21 = vsel %vm3489_vm12, %v3505_v11, 0.0 }
 0x4c0   : > { %v3484_v12 = vcombine.low %v3479_v6, %v3480_v9  ;;  %v3493_v13 = vsel %vm2016_vm2, %v3480_v9, 0.0  ;;  %v3504_v14 = vmul.f32 %v3480_v9, %v3480_v9  ;;  %v3506_v17 = vsel %vm2016_vm2, %v3503_v10, 0.0 }
 0x4c1   : > { %v3494_v15 = vadd.f32 %v3493_v13, %v3492_v8 }
 0x4c2   : > { %3488 = vst [vmem:[%s3487_s26] sm:$0xff] %v3484_v12  ;;  %v3507_v18 = vsel %vm2016_vm2, %v3504_v14, 0.0 }
 0x4c3   : > { %v3496_v19 = vadd.f32 %v3495_v16, %v3494_v15  ;;  %v3508_v20 = vadd.f32 %v3507_v18, %v3506_v17 }
 0x4c5   : > { %3497 = vadd.xlane.f32.xlu1 %v3496_v19  ;;  %v3510_v22 = vadd.f32 %v3509_v21, %v3508_v20 }
 0x4c7   : > { %3511 = vadd.xlane.f32.xlu0 %v3510_v22 }
 0x54e   : > { %v3498_v24 = vpop.xlane.xlu1 %3497 }
 0x54f   : > { %v3499_v26 = vadd.f32 %v3498_v24, %v3491_v23 }
 0x550   : > { %v3512_v27 = vpop.xlane.xlu0 %3511 }
 0x551   : > { %3501 = vst.msk [vmem:[#allocation6] sm:$0xf] %vm3500_vm13, %v3499_v26  ;;  %v3513_v28 = vadd.f32 %v3512_v27, %v3502_v25 }
 0x553   : > { %3514 = vst.msk [vmem:[#allocation7] sm:$0xf] %vm3500_vm13, %v3513_v28 }
 0x554 PF: > { %p3808_p9 = scmp.ne.s32.totalorder %s4133_s9, 2 }
 0x555   : > { %p3809_p10 = scmp.ne.s32.totalorder (!%p3808_p9), %s4129_s30, 0 }
 0x556   : > { %3518 = sbr.rel (%p3808_p9) target bundleno = 1546 (0x60a), region = 72 }
 0x55b   : > { %3521 = sbr.rel (%p3809_p10) target bundleno = 1532 (0x5fc), region = 76 }
 0x560   : > { %v3522_v29 = vld [vmem:[#allocation6] sm:$0xf]  ;;  %v3524_v30 = vld [vmem:[#allocation7] sm:$0xf]  ;;  %v4170_v31 = vmov 0   ;;  %v3542_v45 = vlaneseq  ;;  %vm3548_vm14 = vcmask 257024  }
 0x561   : > { %4050 = vset.pattern.permute.xlu0 %v4170_v31  ;;  %v3523_v32 = vmul.f32 0.001953125, %v3522_v29  ;;  %v3525_v33 = vmul.f32 0.001953125, %v3524_v30  ;;  %v3528_v37 = vld [vmem:[%s4654_s5] sm:$0xf]  ;;  %v4171_v43 = vmov 839922192  }
 0x562   : > { %v3532_v40 = vld [vmem:[%s4655_s6] sm:$0xf]  ;;  %v3540_v44 = vunpack.c.l.s4 %v4171_v43  ;;  %v3543_v47 = vshrl.u32 %v3542_v45, 7 }
 0x563   : > { %v3526_v34 = vmul.f32 %v3523_v32, %v3523_v32 }
 0x564   : > { %v3541_v46 = vunpack.c.0.s8 %v3540_v44 }
 0x565   : > { %v3527_v35 = vsub.f32 %v3525_v33, %v3526_v34 }
 0x566   : > { %v3544_v48 = vsub.s32 %v3541_v46, %v3543_v47 }
 0x567   : > { %v3529_v36 = vadd.f32 1e-05, %v3527_v35 }
 0x569   : > { %4051 = vrsqrt.f32 %v3529_v36 }
 0x576   : > { %v4052_v38 = vpop.eup %4051 }
 0x577   : > { %v3531_v39 = vmul.f32 %v4052_v38, %v3528_v37 }
 0x579   : > { %3537 = vperm.xlu0 %4050, %v3531_v39   ;;  %v3533_v41 = vmul.f32 %v3531_v39, %v3523_v32 }
 0x57b   : > { %v3534_v42 = vsub.f32 %v3532_v40, %v3533_v41 }
 0x57d   : > { %3552 = vperm.xlu0 %4050, %v3534_v42  }
 0x5f4   : > { %v3538_v49 = vpop.permute.xlu0 %3537 }
 0x5f5   : > { %v3545_v50 = vrot.slane %v3538_v49, %v3544_v48 }
 0x5f7   : > { %3547 = vst [vmem:[#allocation9] sm:$0xff] %v3545_v50  ;;  %3549 = vst.msk [vmem:[#allocation9 + $0x8] sm:$0xf] %vm3548_vm14, %v3545_v50 }
 0x5f8   : > { %v3553_v51 = vpop.permute.xlu0 %3552 }
 0x5f9   : > { %v3560_v52 = vrot.slane %v3553_v51, %v3544_v48 }
 0x5fb   : > { %3563 = vst [vmem:[#allocation9 + $0xc] sm:$0xff] %v3560_v52  ;;  %3564 = vst.msk [vmem:[#allocation9 + $0x14] sm:$0xf] %vm3548_vm14, %v3560_v52 }
 0x5fc PF: > { %s3819_s22 = smul.u32 12, %s4129_s30  ;;  %vm3588_vm15 = vcmask 257024  }
 0x5fe   : > { %v3570_v53 = vld [vmem:[#allocation9] sm:$0xff]  ;;  %v3571_v54 = vld [vmem:[#allocation9 + $0x8] sm:$0xf]  ;;  %s3567_s20 = scalar_lea.vmem [#allocation3], %s3819_s22  ;;  %s3580_s25 = scalar_lea.vmem [#allocation10], %s3819_s22 }
 0x5ff   : > { %v3568_v56 = vld [vmem:[%s3567_s20] sm:$0xff]  ;;  %v3569_v57 = vld [vmem:[%s3567_s20 + $0x8] sm:$0xf] }
 0x600   : > { %v3572_v59 = vmul.f32 %v3570_v53, %v3568_v56  ;;  %v3573_v60 = vmul.f32 %v3571_v54, %v3569_v57  ;;  %v3581_v61 = vld [vmem:[%s3580_s25] sm:$0xff]  ;;  %v3582_v62 = vld [vmem:[%s3580_s25 + $0x8] sm:$0xf] }
 0x602   : > { %v3575_v55 = vld [vmem:[#allocation9 + $0xc] sm:$0xff]  ;;  %v3576_v58 = vld [vmem:[#allocation9 + $0x14] sm:$0xf] }
 0x603   : > { %v3577_v63 = vadd.f32 %v3575_v55, %v3572_v59  ;;  %v3578_v0 = vadd.f32 %v3576_v58, %v3573_v60 }
 0x605   : > { %v3583_v1 = vadd.f32 %v3581_v61, %v3577_v63  ;;  %v3584_v2 = vadd.f32 %v3582_v62, %v3578_v0 }
 0x607   : > { %v3585_v3 = vmax.f32 %v3583_v1, 0.0  ;;  %v3586_v4 = vmax.f32 %v3584_v2, 0.0 }
 0x609   : > { %3587 = vst [vmem:[%s4298_s21] sm:$0xff] %v3585_v3  ;;  %3589 = vst.msk [vmem:[%s4298_s21 + $0x8] sm:$0xf] %vm3588_vm15, %v3586_v4 }
 0x60a PF: > { %p3598_p11 = scmp.eq.s32.totalorder %s4133_s9, 2  ;;  %s3607_s26 = sshll.u32 %s4298_s21, 4  ;;  %s3608_s26 = int_to_ptr.vmem [resolvable:$true] %s3607_s26 }
 0x60b   : > { %s4667_s22 = sand.u32 1, %s4121_s28   ;;  %s4053_s25 = scalar_lea.vmem %s3608_s26, 192 }
 0x60c   : > { %s4684_s30 = smov (!%p3598_p11, %s4129_s30), 0  ;;  %s3591_s20 = scalar_lea.sflag [#allocation12], %s4667_s22 }
 0x60d   : > { %s3949_s17 = smul.u32 192, %s4684_s30  ;;  %p4054_p12 = scmp.ne.s32.totalorder %s3608_s26, %s4053_s25 }
 0x60e   : > { %s4172_s0 = smov [#allocation11]  }
 0x60f   : > { %s3605_s24 = scalar_lea.hbm %s4657_s8, %s3949_s17  ;;  %p4055_p13 = pnand %p4054_p12, %p4273_p7 }
 0x610   : > { %s4057_s1 = sshll.u32 %s4172_s0, 4  ;;  %s4058_s1 = int_to_ptr.vmem [resolvable:$false] %s4057_s1 }
 0x611   : > { %p4056_p0 = pneg %p4055_p13  ;;  %s4059_s2 = scalar_lea.vmem %s4058_s1, 384 }
 0x612   : > { %p4060_p1 = scmp.lt.s32.totalorder %s3608_s26, %s4058_s1  ;;  %p4061_p2 = scmp.lt.s32.totalorder %s4059_s2, %s4053_s25 }
 0x614   : > { %p4062_p3 = por %p4061_p2, %p4060_p1 }
 0x616   : > { %p4063_p4 = pnand %p4062_p3, %p4056_p0 }
 0x618   : > { %4066 = shalt.err (!%p4063_p4)
}
 0x619   : > { %s4067_s30 = scalar_lea.hbm %s3605_s24, 192  ;;  %s4071_s17 = scalar_lea.hbm %s4657_s8, 384 }
 0x61a   : > { %p4068_p5 = scmp.ne.s32.totalorder %s3605_s24, %s4067_s30  ;;  %p4072_p10 = scmp.lt.s32.totalorder %s3605_s24, %s4657_s8 }
 0x61b   : > { %p4073_p11 = scmp.lt.s32.totalorder %s4071_s17, %s4067_s30 }
 0x61c   : > { %p4069_p6 = pnand %p4068_p5, %p4273_p7 }
 0x61d   : > { %p4074_p12 = por %p4073_p11, %p4072_p10 }
 0x61e   : > { %p4070_p9 = pneg %p4069_p6 }
 0x620   : > { %p4075_p13 = pnand %p4074_p12, %p4070_p9 }
 0x622   : > { %4078 = shalt.err (!%p4075_p13)
}
 0x623   : > { %3950 = dma.vmem_to_hbm [thread:$0]  (%p4273_p7), %s3608_s26, 192, %s3605_s24, %s3591_s20  }
 0x624 PF: > { %p3956_p0 = scmp.ge.s32.totalorder %s4145_s12, 2  ;;  %s3619_s0 = sand.u32 1, %s4117_s27  }
 0x625   : > { %s3620_s1 = scalar_lea.sflag [#allocation12], %s3619_s0 }
 0x626   : > { %p3953_p1 = pnand %p3956_p0, %p4277_p8 }
 0x628   : > { %p3954_p2 = pneg %p3953_p1 }
 0x62a   : > { %4112 = dma.done.wait (%p3954_p2), %s3620_s1, 192  }
 0x62b   : > { %4114 = vsyncadd (%p3954_p2), %s3620_s1, 4294967104  ;;  %s21_s12 = sadd.s32 1, %s4145_s12   ;;  %s4668_s27 = smov %s4121_s28 }
 0x62c   : > { %p18_p3 = scmp.ge.s32.totalorder %s21_s12, 8   ;;  %s4669_s28 = smov %s4125_s29 }
 0x62d   : > { %s4670_s29 = smov %s4287_s23  ;;  %s4671_s30 = smov %s4137_s10 }
 0x62e   : > { %s4672_s9 = smov %s4141_s11  ;;  %s4673_s10 = smov %s4676_s14 }
 0x62f   : > { %s4674_s11 = smov %s4680_s15  ;;  %20 = sbr.rel (!%p18_p3) target bundleno = 9 (0x9), region = 137 }
 0x634   :  { %3625 = vsyncpa [#allocation12], 1 }
 0x635   :  { %3627 = vsyncpa [#allocation12 + $0x1], 1 }

</bundles_post_ra>
